<compile_context>
chip_gen: v5e
topology: v5e:2x2
jax: 0.10.0
libtpu: 0.0.40
codegen_flags: <defaults>
</compile_context>

<pallas_src>
import functools

import jax
import jax.numpy as jnp
from jax import lax
from jax.experimental import pallas as pl
from jax.experimental.pallas import tpu as pltpu


def ltm_kernel(x_ref, wqkv_ref, bqkv_ref, w1_ref, b1_ref, w2_ref, b2_ref, g_ref,
               y_ref, loss_ref, qk_scratch, *, num_layers: int, eps: float):
    T = x_ref.shape[0]            # rows in this tile
    D = wqkv_ref.shape[0]         # dim_model

    def mm(a, w):
        # MXU matmul: operands in the weight dtype (bf16 fast path), f32 accumulate.
        return jnp.dot(a.astype(w.dtype), w, preferred_element_type=jnp.float32)

    x = x_ref[...]

    # Fused q/k/v projection: one (T, D) @ (D, 3D) matmul.  The bias is a (1, 3D)
    # row added via implicit broadcasting (no materialized full-size temp).
    qkv = mm(x, wqkv_ref[...]) + bqkv_ref[...].astype(jnp.float32)

    # Stack q and k as the two row blocks of one (2T, D) VMEM scratch so the
    # shared MLP runs ONCE per layer on a (2T, .) operand (no concat copies).
    qk_scratch[pl.ds(0, T), :] = qkv[:, :D]
    qk_scratch[pl.ds(T, T), :] = qkv[:, D:2 * D]
    v = qkv[:, 2 * D:]

    w1 = w1_ref[...]
    w2 = w2_ref[...]
    b1 = b1_ref[...].astype(jnp.float32)      # (1, F) — implicit sublane broadcast
    b2 = b2_ref[...].astype(jnp.float32)      # (1, D)

    def layer_step(h):
        h1 = mm(h, w1) + b1
        h1 = h1 * jax.nn.sigmoid(h1)          # SiLU; Dropout is identity in eval
        return mm(h1, w2) + b2

    qk = qk_scratch[...]
    # nn.ModuleList holds the *same* layer object num_layers times -> reapply it.
    if num_layers <= 6:
        for _ in range(num_layers):
            qk = layer_step(qk)
    else:
        # Bound live ranges for deep stacks instead of fully unrolling.
        qk = lax.fori_loop(0, num_layers, lambda _, h: layer_step(h), qk)

    qk_scratch[...] = qk
    q = qk_scratch[pl.ds(0, T), :]
    k = qk_scratch[pl.ds(T, T), :]

    # RMSNorm(q): q * rsqrt(mean(q^2, -1) + eps) * weight
    ms = jnp.mean(q * q, axis=-1, keepdims=True)
    y = q * lax.rsqrt(ms + eps) * g_ref[...].astype(jnp.float32)
    # TODO(synk): when dim_model is not a multiple of 128 (smoke-test D=32) this
    #             store is lane-masked; the real module (dim_model=1024) is dense.
    y_ref[...] = y.astype(y_ref.dtype)

    # Per-tile partial of the associative-memory loss (lane-dense block); the
    # wrapper reduces across tiles, keeping the grid axis fully parallel.
    diff = k - v
    partial = jnp.sum(diff * diff)
    loss_ref[...] = jnp.broadcast_to(partial, loss_ref.shape).astype(jnp.float32)


def pack_params(params, matmul_dtype=jnp.bfloat16):
    """Fuse / cast weights ONCE (outside the per-call wrapper)."""
    wdt = matmul_dtype if matmul_dtype is not None else params["wq"].dtype
    return {
        "wqkv": jnp.concatenate(
            [params["wq"], params["wk"], params["wv"]], axis=1).astype(wdt),
        "bqkv": jnp.concatenate(
            [params["bq"], params["bk"], params["bv"]], axis=1).astype(jnp.float32),
        "w1": params["w1"].astype(wdt),
        "b1": params["b1"].astype(jnp.float32),
        "w2": params["w2"].astype(wdt),
        "b2": params["b2"].astype(jnp.float32),
        "g": params["g"].astype(jnp.float32),
    }


def _tpu_generation():
    try:
        kind = jax.devices()[0].device_kind.lower()
    except Exception:
        kind = ""
    if "v7" in kind:
        return "v7x"
    if "v6" in kind:
        return "v6e"
    if "v5" in kind:
        return "v5e"
    return "unknown"


def _default_tiling(gen):
    """(tile_rows, vmem_limit_bytes) per generation."""
    if gen == "v7x":
        return 128, 56 * 1024 * 1024    # 64 MiB VMEM/TC: small tiles, 2T=256 == MXU pass
    if gen == "v6e":
        return 512, 96 * 1024 * 1024    # 128 MiB VMEM: amortize per-step overhead
    if gen == "v5e":
        return 256, 96 * 1024 * 1024    # 4x128x128 MXU, f32 VPU work stays hidden
    return 256, 64 * 1024 * 1024        # conservative unknown


def long_term_memory(x, packed, *, num_layers: int, eps: float,
                     tile_rows=None, vmem_limit_bytes=None):
    B, S, D = x.shape
    F = packed["w1"].shape[1]
    N = B * S
    assert N % 8 == 0, "B*S must be a multiple of 8"

    gen = _tpu_generation()
    d_tile, d_vmem = _default_tiling(gen)
    if tile_rows is None:
        tile_rows = d_tile
    if vmem_limit_bytes is None:
        vmem_limit_bytes = d_vmem

    # Largest row tile <= tile_rows that divides N and is a multiple of 8.
    tile_rows = max(8, min(tile_rows, N))
    while tile_rows > 8 and (N % tile_rows != 0 or tile_rows % 8 != 0):
        tile_rows -= 8
    # v7x: two TensorCores share the "parallel" grid axis -> prefer an even tile count.
    if gen == "v7x" and (N // tile_rows) % 2 == 1 and tile_rows % 16 == 0:
        tile_rows //= 2
    assert N % tile_rows == 0 and tile_rows % 8 == 0
    num_tiles = N // tile_rows

    x2 = x.reshape(N, D)
    kernel = functools.partial(ltm_kernel, num_layers=num_layers, eps=eps)

    def build_call(single_buffer_weights):
        if single_buffer_weights:
            # Constant index_map => DMA'd once; single-buffer to halve resident VMEM.
            def const2d(r, c):
                return pl.BlockSpec((r, c), lambda i: (0, 0),
                                    pipeline_mode=pl.Buffered(1))
        else:
            def const2d(r, c):
                return pl.BlockSpec((r, c), lambda i: (0, 0))

        return pl.pallas_call(
            kernel,
            out_shape=(
                jax.ShapeDtypeStruct((N, D), x.dtype),
                jax.ShapeDtypeStruct((num_tiles, 1, 128), jnp.float32),
            ),
            grid_spec=pltpu.PrefetchScalarGridSpec(
                num_scalar_prefetch=0,
                grid=(num_tiles,),
                in_specs=[
                    pl.BlockSpec((tile_rows, D), lambda i: (i, 0)),   # x rows
                    const2d(D, 3 * D), const2d(1, 3 * D),             # fused Wqkv, bqkv
                    const2d(D, F), const2d(1, F),                     # W1, b1
                    const2d(F, D), const2d(1, D),                     # W2, b2
                    const2d(1, D),                                    # RMSNorm weight
                ],
                out_specs=[
                    pl.BlockSpec((tile_rows, D), lambda i: (i, 0)),   # y rows
                    pl.BlockSpec((1, 1, 128), lambda i: (i, 0, 0)),   # per-tile loss partial
                ],
                scratch_shapes=[pltpu.VMEM((2 * tile_rows, D), jnp.float32)],
            ),
            compiler_params=pltpu.CompilerParams(
                dimension_semantics=("parallel",),        # tiles are fully independent
                vmem_limit_bytes=vmem_limit_bytes,
            ),
        )

    args = (x2, packed["wqkv"], packed["bqkv"], packed["w1"], packed["b1"],
            packed["w2"], packed["b2"], packed["g"])
    try:
        y2, partials = build_call(single_buffer_weights=True)(*args)
    except Exception:
        # Fallback for jax builds without BlockSpec(pipeline_mode=...) support.
        y2, partials = build_call(single_buffer_weights=False)(*args)

    loss = jnp.sum(partials[:, 0, 0]) / jnp.float32(N * D)
    return y2.reshape(B, S, D), loss


def reference(x, params, *, num_layers, eps, matmul_dtype=None):
    """Pure-JAX reference for validation (mirrors the kernel's matmul precision)."""
    B, S, D = x.shape
    h = x.reshape(B * S, D).astype(jnp.float32)

    def cast(a):
        return a.astype(matmul_dtype) if matmul_dtype is not None else a

    def lin(a, w, b):
        return jnp.dot(cast(a), cast(w), preferred_element_type=jnp.float32) + b

    q = lin(h, params["wq"], params["bq"])
    k = lin(h, params["wk"], params["bk"])
    v = lin(h, params["wv"], params["bv"])

    def mlp(a):
        h1 = lin(a, params["w1"], params["b1"])
        h1 = jax.nn.silu(h1)
        return lin(h1, params["w2"], params["b2"])

    for _ in range(num_layers):
        q = mlp(q)
        k = mlp(k)
    ms = jnp.mean(q * q, axis=-1, keepdims=True)
    y = q * lax.rsqrt(ms + eps) * params["g"]
    loss = jnp.mean((k - v) ** 2)
    return y.reshape(B, S, D), loss


if __name__ == "__main__":
    # Small, forward-consistent shapes.
    B, S = 2, 8
    DIM_MODEL = 32
    DIM_FFN = 64
    NUM_LAYERS = 4
    EPS = 0.02

    key = jax.random.PRNGKey(0)
    ks = jax.random.split(key, 12)
    scale = 0.05
    params = {
        "wq": scale * jax.random.normal(ks[0], (DIM_MODEL, DIM_MODEL), jnp.float32),
        "bq": scale * jax.random.normal(ks[1], (1, DIM_MODEL), jnp.float32),
        "wk": scale * jax.random.normal(ks[2], (DIM_MODEL, DIM_MODEL), jnp.float32),
        "bk": scale * jax.random.normal(ks[3], (1, DIM_MODEL), jnp.float32),
        "wv": scale * jax.random.normal(ks[4], (DIM_MODEL, DIM_MODEL), jnp.float32),
        "bv": scale * jax.random.normal(ks[5], (1, DIM_MODEL), jnp.float32),
        "w1": scale * jax.random.normal(ks[6], (DIM_MODEL, DIM_FFN), jnp.float32),
        "b1": scale * jax.random.normal(ks[7], (1, DIM_FFN), jnp.float32),
        "w2": scale * jax.random.normal(ks[8], (DIM_FFN, DIM_MODEL), jnp.float32),
        "b2": scale * jax.random.normal(ks[9], (1, DIM_MODEL), jnp.float32),
        "g": jnp.ones((1, DIM_MODEL), jnp.float32),   # nn.RMSNorm weight init
    }

    x = jax.random.normal(ks[10], (B, S, DIM_MODEL), jnp.float32)

    # Weights fused + cast to bf16 once (not per forward call); f32 accumulation.
    packed = pack_params(params, matmul_dtype=jnp.bfloat16)

    y, loss = long_term_memory(x, packed, num_layers=NUM_LAYERS, eps=EPS)
    jax.block_until_ready((y, loss))

    y_ref, loss_ref_v = reference(x, params, num_layers=NUM_LAYERS, eps=EPS,
                                  matmul_dtype=jnp.bfloat16)
    assert jnp.allclose(y, y_ref, atol=1e-3, rtol=1e-3), "output mismatch"
    assert jnp.allclose(loss, loss_ref_v, atol=1e-5, rtol=1e-3), "loss mismatch"

    print("KERNEL_OK")
</pallas_src>

<mosaic_0001>
module attributes {stable_mosaic.version = 11 : i64} {
  func.func @ltm_kernel(%arg0: i32, %arg1: memref<16x32xf32, #tpu.memory_space<vmem>>, %arg2: memref<32x96xbf16, #tpu.memory_space<vmem>>, %arg3: memref<1x96xf32, #tpu.memory_space<vmem>>, %arg4: memref<32x64xbf16, #tpu.memory_space<vmem>>, %arg5: memref<1x64xf32, #tpu.memory_space<vmem>>, %arg6: memref<64x32xbf16, #tpu.memory_space<vmem>>, %arg7: memref<1x32xf32, #tpu.memory_space<vmem>>, %arg8: memref<1x32xf32, #tpu.memory_space<vmem>>, %arg9: memref<16x32xf32, #tpu.memory_space<vmem>>, %arg10: memref<1x1x128xf32, #tpu.memory_space<vmem>>, %arg11: memref<32x32xf32, #tpu.memory_space<vmem>>) attributes {dimension_semantics = [#tpu.dimension_semantics<parallel>], iteration_bounds = array<i64: 1>, scalar_prefetch = 0 : i64, scratch_operands = 1 : i64, tpu.core_type = #tpu.core_type<tc>, window_params = [{transform_indices = @transform_0, window_bounds = array<i64: 16, 32>}, {pipeline_mode = #tpu.pipeline_mode<synchronous>, transform_indices = @transform_1, window_bounds = array<i64: 32, 96>}, {pipeline_mode = #tpu.pipeline_mode<synchronous>, transform_indices = @transform_2, window_bounds = array<i64: 1, 96>}, {pipeline_mode = #tpu.pipeline_mode<synchronous>, transform_indices = @transform_3, window_bounds = array<i64: 32, 64>}, {pipeline_mode = #tpu.pipeline_mode<synchronous>, transform_indices = @transform_4, window_bounds = array<i64: 1, 64>}, {pipeline_mode = #tpu.pipeline_mode<synchronous>, transform_indices = @transform_5, window_bounds = array<i64: 64, 32>}, {pipeline_mode = #tpu.pipeline_mode<synchronous>, transform_indices = @transform_6, window_bounds = array<i64: 1, 32>}, {pipeline_mode = #tpu.pipeline_mode<synchronous>, transform_indices = @transform_7, window_bounds = array<i64: 1, 32>}, {transform_indices = @transform_8, window_bounds = array<i64: 16, 32>}, {transform_indices = @transform_9, window_bounds = array<i64: 1, 1, 128>}]} {
    %c0 = arith.constant 0 : index
    %c0_0 = arith.constant 0 : index
    %0 = vector.load %arg1[%c0, %c0_0] : memref<16x32xf32, #tpu.memory_space<vmem>>, vector<16x32xf32>
    %c0_1 = arith.constant 0 : index
    %c0_2 = arith.constant 0 : index
    %1 = vector.load %arg2[%c0_1, %c0_2] : memref<32x96xbf16, #tpu.memory_space<vmem>>, vector<32x96xbf16>
    %2 = arith.truncf %0 : vector<16x32xf32> to vector<16x32xbf16>
    %cst = arith.constant dense<0.000000e+00> : vector<16x96xf32>
    %3 = tpu.matmul %2, %1, %cst {dimension_numbers = #tpu.dot_dimension_numbers<[1], [0], [0], [1], [0, 0, 1, 1], [], []>} : vector<16x32xbf16>, vector<32x96xbf16>, vector<16x96xf32> -> vector<16x96xf32>
    %c0_3 = arith.constant 0 : index
    %c0_4 = arith.constant 0 : index
    %4 = vector.load %arg3[%c0_3, %c0_4] : memref<1x96xf32, #tpu.memory_space<vmem>>, vector<1x96xf32>
    %5 = vector.broadcast %4 : vector<1x96xf32> to vector<16x96xf32>
    %6 = arith.addf %3, %5 : vector<16x96xf32>
    %7 = vector.extract_strided_slice %6 {offsets = [0, 0], sizes = [16, 32], strides = [1, 1]} : vector<16x96xf32> to vector<16x32xf32>
    %c0_5 = arith.constant 0 : index
    %c0_6 = arith.constant 0 : index
    %8 = vector.load %arg11[%c0_5, %c0_6] : memref<32x32xf32, #tpu.memory_space<vmem>>, vector<16x32xf32>
    tpu.vector_store %arg11[%c0_5, %c0_6], %7 {strides = array<i32>} : memref<32x32xf32, #tpu.memory_space<vmem>>, vector<16x32xf32>,
    %9 = vector.extract_strided_slice %6 {offsets = [0, 32], sizes = [16, 32], strides = [1, 1]} : vector<16x96xf32> to vector<16x32xf32>
    %c16 = arith.constant 16 : index
    %c0_7 = arith.constant 0 : index
    %10 = vector.load %arg11[%c16, %c0_7] : memref<32x32xf32, #tpu.memory_space<vmem>>, vector<16x32xf32>
    tpu.vector_store %arg11[%c16, %c0_7], %9 {strides = array<i32>} : memref<32x32xf32, #tpu.memory_space<vmem>>, vector<16x32xf32>,
    %11 = vector.extract_strided_slice %6 {offsets = [0, 64], sizes = [16, 32], strides = [1, 1]} : vector<16x96xf32> to vector<16x32xf32>
    %c0_8 = arith.constant 0 : index
    %c0_9 = arith.constant 0 : index
    %12 = vector.load %arg4[%c0_8, %c0_9] : memref<32x64xbf16, #tpu.memory_space<vmem>>, vector<32x64xbf16>
    %c0_10 = arith.constant 0 : index
    %c0_11 = arith.constant 0 : index
    %13 = vector.load %arg6[%c0_10, %c0_11] : memref<64x32xbf16, #tpu.memory_space<vmem>>, vector<64x32xbf16>
    %c0_12 = arith.constant 0 : index
    %c0_13 = arith.constant 0 : index
    %14 = vector.load %arg5[%c0_12, %c0_13] : memref<1x64xf32, #tpu.memory_space<vmem>>, vector<1x64xf32>
    %c0_14 = arith.constant 0 : index
    %c0_15 = arith.constant 0 : index
    %15 = vector.load %arg7[%c0_14, %c0_15] : memref<1x32xf32, #tpu.memory_space<vmem>>, vector<1x32xf32>
    %c0_16 = arith.constant 0 : index
    %c0_17 = arith.constant 0 : index
    %16 = vector.load %arg11[%c0_16, %c0_17] : memref<32x32xf32, #tpu.memory_space<vmem>>, vector<32x32xf32>
    %17 = arith.truncf %16 : vector<32x32xf32> to vector<32x32xbf16>
    %cst_18 = arith.constant dense<0.000000e+00> : vector<32x64xf32>
    %18 = tpu.matmul %17, %12, %cst_18 {dimension_numbers = #tpu.dot_dimension_numbers<[1], [0], [0], [1], [0, 0, 1, 1], [], []>} : vector<32x32xbf16>, vector<32x64xbf16>, vector<32x64xf32> -> vector<32x64xf32>
    %19 = vector.broadcast %14 : vector<1x64xf32> to vector<32x64xf32>
    %20 = arith.addf %18, %19 : vector<32x64xf32>
    %21 = arith.negf %20 : vector<32x64xf32>
    %22 = math.exp %21 : vector<32x64xf32>
    %cst_19 = arith.constant 1.000000e+00 : f32
    %23 = vector.broadcast %cst_19 : f32 to vector<32x64xf32>
    %24 = arith.addf %23, %22 : vector<32x64xf32>
    %25 = arith.divf %23, %24 : vector<32x64xf32>
    %26 = arith.mulf %20, %25 : vector<32x64xf32>
    %27 = arith.truncf %26 : vector<32x64xf32> to vector<32x64xbf16>
    %cst_20 = arith.constant dense<0.000000e+00> : vector<32x32xf32>
    %28 = tpu.matmul %27, %13, %cst_20 {dimension_numbers = #tpu.dot_dimension_numbers<[1], [0], [0], [1], [0, 0, 1, 1], [], []>} : vector<32x64xbf16>, vector<64x32xbf16>, vector<32x32xf32> -> vector<32x32xf32>
    %29 = vector.broadcast %15 : vector<1x32xf32> to vector<32x32xf32>
    %30 = arith.addf %28, %29 : vector<32x32xf32>
    %31 = arith.truncf %30 : vector<32x32xf32> to vector<32x32xbf16>
    %cst_21 = arith.constant dense<0.000000e+00> : vector<32x64xf32>
    %32 = tpu.matmul %31, %12, %cst_21 {dimension_numbers = #tpu.dot_dimension_numbers<[1], [0], [0], [1], [0, 0, 1, 1], [], []>} : vector<32x32xbf16>, vector<32x64xbf16>, vector<32x64xf32> -> vector<32x64xf32>
    %33 = vector.broadcast %14 : vector<1x64xf32> to vector<32x64xf32>
    %34 = arith.addf %32, %33 : vector<32x64xf32>
    %35 = arith.negf %34 : vector<32x64xf32>
    %36 = math.exp %35 : vector<32x64xf32>
    %cst_22 = arith.constant 1.000000e+00 : f32
    %37 = vector.broadcast %cst_22 : f32 to vector<32x64xf32>
    %38 = arith.addf %37, %36 : vector<32x64xf32>
    %39 = arith.divf %37, %38 : vector<32x64xf32>
    %40 = arith.mulf %34, %39 : vector<32x64xf32>
    %41 = arith.truncf %40 : vector<32x64xf32> to vector<32x64xbf16>
    %cst_23 = arith.constant dense<0.000000e+00> : vector<32x32xf32>
    %42 = tpu.matmul %41, %13, %cst_23 {dimension_numbers = #tpu.dot_dimension_numbers<[1], [0], [0], [1], [0, 0, 1, 1], [], []>} : vector<32x64xbf16>, vector<64x32xbf16>, vector<32x32xf32> -> vector<32x32xf32>
    %43 = vector.broadcast %15 : vector<1x32xf32> to vector<32x32xf32>
    %44 = arith.addf %42, %43 : vector<32x32xf32>
    %45 = arith.truncf %44 : vector<32x32xf32> to vector<32x32xbf16>
    %cst_24 = arith.constant dense<0.000000e+00> : vector<32x64xf32>
    %46 = tpu.matmul %45, %12, %cst_24 {dimension_numbers = #tpu.dot_dimension_numbers<[1], [0], [0], [1], [0, 0, 1, 1], [], []>} : vector<32x32xbf16>, vector<32x64xbf16>, vector<32x64xf32> -> vector<32x64xf32>
    %47 = vector.broadcast %14 : vector<1x64xf32> to vector<32x64xf32>
    %48 = arith.addf %46, %47 : vector<32x64xf32>
    %49 = arith.negf %48 : vector<32x64xf32>
    %50 = math.exp %49 : vector<32x64xf32>
    %cst_25 = arith.constant 1.000000e+00 : f32
    %51 = vector.broadcast %cst_25 : f32 to vector<32x64xf32>
    %52 = arith.addf %51, %50 : vector<32x64xf32>
    %53 = arith.divf %51, %52 : vector<32x64xf32>
    %54 = arith.mulf %48, %53 : vector<32x64xf32>
    %55 = arith.truncf %54 : vector<32x64xf32> to vector<32x64xbf16>
    %cst_26 = arith.constant dense<0.000000e+00> : vector<32x32xf32>
    %56 = tpu.matmul %55, %13, %cst_26 {dimension_numbers = #tpu.dot_dimension_numbers<[1], [0], [0], [1], [0, 0, 1, 1], [], []>} : vector<32x64xbf16>, vector<64x32xbf16>, vector<32x32xf32> -> vector<32x32xf32>
    %57 = vector.broadcast %15 : vector<1x32xf32> to vector<32x32xf32>
    %58 = arith.addf %56, %57 : vector<32x32xf32>
    %59 = arith.truncf %58 : vector<32x32xf32> to vector<32x32xbf16>
    %cst_27 = arith.constant dense<0.000000e+00> : vector<32x64xf32>
    %60 = tpu.matmul %59, %12, %cst_27 {dimension_numbers = #tpu.dot_dimension_numbers<[1], [0], [0], [1], [0, 0, 1, 1], [], []>} : vector<32x32xbf16>, vector<32x64xbf16>, vector<32x64xf32> -> vector<32x64xf32>
    %61 = vector.broadcast %14 : vector<1x64xf32> to vector<32x64xf32>
    %62 = arith.addf %60, %61 : vector<32x64xf32>
    %63 = arith.negf %62 : vector<32x64xf32>
    %64 = math.exp %63 : vector<32x64xf32>
    %cst_28 = arith.constant 1.000000e+00 : f32
    %65 = vector.broadcast %cst_28 : f32 to vector<32x64xf32>
    %66 = arith.addf %65, %64 : vector<32x64xf32>
    %67 = arith.divf %65, %66 : vector<32x64xf32>
    %68 = arith.mulf %62, %67 : vector<32x64xf32>
    %69 = arith.truncf %68 : vector<32x64xf32> to vector<32x64xbf16>
    %cst_29 = arith.constant dense<0.000000e+00> : vector<32x32xf32>
    %70 = tpu.matmul %69, %13, %cst_29 {dimension_numbers = #tpu.dot_dimension_numbers<[1], [0], [0], [1], [0, 0, 1, 1], [], []>} : vector<32x64xbf16>, vector<64x32xbf16>, vector<32x32xf32> -> vector<32x32xf32>
    %71 = vector.broadcast %15 : vector<1x32xf32> to vector<32x32xf32>
    %72 = arith.addf %70, %71 : vector<32x32xf32>
    %c0_30 = arith.constant 0 : index
    %c0_31 = arith.constant 0 : index
    %73 = vector.load %arg11[%c0_30, %c0_31] : memref<32x32xf32, #tpu.memory_space<vmem>>, vector<32x32xf32>
    tpu.vector_store %arg11[%c0_30, %c0_31], %72 {strides = array<i32>} : memref<32x32xf32, #tpu.memory_space<vmem>>, vector<32x32xf32>,
    %c0_32 = arith.constant 0 : index
    %c0_33 = arith.constant 0 : index
    %74 = vector.load %arg11[%c0_32, %c0_33] : memref<32x32xf32, #tpu.memory_space<vmem>>, vector<16x32xf32>
    %c16_34 = arith.constant 16 : index
    %c0_35 = arith.constant 0 : index
    %75 = vector.load %arg11[%c16_34, %c0_35] : memref<32x32xf32, #tpu.memory_space<vmem>>, vector<16x32xf32>
    %76 = arith.mulf %74, %74 : vector<16x32xf32>
    %cst_36 = arith.constant dense<0.000000e+00> : vector<16xf32>
    %77 = vector.multi_reduction <add>, %76, %cst_36 [1] : vector<16x32xf32> to vector<16xf32>
    %78 = vector.shape_cast %77 : vector<16xf32> to vector<16x1xf32>
    %cst_37 = arith.constant 3.200000e+01 : f32
    %79 = vector.broadcast %cst_37 : f32 to vector<16x1xf32>
    %80 = arith.divf %78, %79 : vector<16x1xf32>
    %cst_38 = arith.constant 2.000000e-02 : f32
    %81 = vector.broadcast %cst_38 : f32 to vector<16x1xf32>
    %82 = arith.addf %80, %81 : vector<16x1xf32>
    %83 = math.rsqrt %82 : vector<16x1xf32>
    %84 = vector.broadcast %83 : vector<16x1xf32> to vector<16x32xf32>
    %85 = arith.mulf %74, %84 : vector<16x32xf32>
    %c0_39 = arith.constant 0 : index
    %c0_40 = arith.constant 0 : index
    %86 = vector.load %arg8[%c0_39, %c0_40] : memref<1x32xf32, #tpu.memory_space<vmem>>, vector<1x32xf32>
    %87 = vector.broadcast %86 : vector<1x32xf32> to vector<16x32xf32>
    %88 = arith.mulf %85, %87 : vector<16x32xf32>
    %c0_41 = arith.constant 0 : index
    %c0_42 = arith.constant 0 : index
    %89 = vector.load %arg9[%c0_41, %c0_42] : memref<16x32xf32, #tpu.memory_space<vmem>>, vector<16x32xf32>
    tpu.vector_store %arg9[%c0_41, %c0_42], %88 {strides = array<i32>} : memref<16x32xf32, #tpu.memory_space<vmem>>, vector<16x32xf32>,
    %90 = arith.subf %75, %11 : vector<16x32xf32>
    %91 = arith.mulf %90, %90 : vector<16x32xf32>
    %92 = vector.shape_cast %91 : vector<16x32xf32> to vector<1x16x32xf32>
    %cst_43 = arith.constant dense<0.000000e+00> : vector<1xf32>
    %93 = vector.multi_reduction <add>, %92, %cst_43 [1, 2] : vector<1x16x32xf32> to vector<1xf32>
    %94 = vector.shape_cast %93 : vector<1xf32> to vector<1x1x1xf32>
    %95 = vector.extract %94[0, 0, 0] : f32 from vector<1x1x1xf32>
    %96 = vector.broadcast %95 : f32 to vector<1x1x128xf32>
    %c0_44 = arith.constant 0 : index
    %c0_45 = arith.constant 0 : index
    %c0_46 = arith.constant 0 : index
    %97 = vector.load %arg10[%c0_44, %c0_45, %c0_46] : memref<1x1x128xf32, #tpu.memory_space<vmem>>, vector<1x1x128xf32>
    tpu.vector_store %arg10[%c0_44, %c0_45, %c0_46], %96 {strides = array<i32>} : memref<1x1x128xf32, #tpu.memory_space<vmem>>, vector<1x1x128xf32>,
    return
  }
  func.func @transform_0(%arg0: i32) -> (i32, i32) {
    %c0_i32 = arith.constant 0 : i32
    %c0_i32_0 = arith.constant 0 : i32
    return %arg0, %c0_i32 : i32, i32
  }
  func.func @transform_1(%arg0: i32) -> (i32, i32) {
    %c0_i32 = arith.constant 0 : i32
    %c0_i32_0 = arith.constant 0 : i32
    %c0_i32_1 = arith.constant 0 : i32
    return %c0_i32, %c0_i32_0 : i32, i32
  }
  func.func @transform_2(%arg0: i32) -> (i32, i32) {
    %c0_i32 = arith.constant 0 : i32
    %c0_i32_0 = arith.constant 0 : i32
    %c0_i32_1 = arith.constant 0 : i32
    return %c0_i32, %c0_i32_0 : i32, i32
  }
  func.func @transform_3(%arg0: i32) -> (i32, i32) {
    %c0_i32 = arith.constant 0 : i32
    %c0_i32_0 = arith.constant 0 : i32
    %c0_i32_1 = arith.constant 0 : i32
    return %c0_i32, %c0_i32_0 : i32, i32
  }
  func.func @transform_4(%arg0: i32) -> (i32, i32) {
    %c0_i32 = arith.constant 0 : i32
    %c0_i32_0 = arith.constant 0 : i32
    %c0_i32_1 = arith.constant 0 : i32
    return %c0_i32, %c0_i32_0 : i32, i32
  }
  func.func @transform_5(%arg0: i32) -> (i32, i32) {
    %c0_i32 = arith.constant 0 : i32
    %c0_i32_0 = arith.constant 0 : i32
    %c0_i32_1 = arith.constant 0 : i32
    return %c0_i32, %c0_i32_0 : i32, i32
  }
  func.func @transform_6(%arg0: i32) -> (i32, i32) {
    %c0_i32 = arith.constant 0 : i32
    %c0_i32_0 = arith.constant 0 : i32
    %c0_i32_1 = arith.constant 0 : i32
    return %c0_i32, %c0_i32_0 : i32, i32
  }
  func.func @transform_7(%arg0: i32) -> (i32, i32) {
    %c0_i32 = arith.constant 0 : i32
    %c0_i32_0 = arith.constant 0 : i32
    %c0_i32_1 = arith.constant 0 : i32
    return %c0_i32, %c0_i32_0 : i32, i32
  }
  func.func @transform_8(%arg0: i32) -> (i32, i32) {
    %c0_i32 = arith.constant 0 : i32
    %c0_i32_0 = arith.constant 0 : i32
    return %arg0, %c0_i32 : i32, i32
  }
  func.func @transform_9(%arg0: i32) -> (i32, i32, i32) {
    %c0_i32 = arith.constant 0 : i32
    %c0_i32_0 = arith.constant 0 : i32
    %c0_i32_1 = arith.constant 0 : i32
    return %arg0, %c0_i32, %c0_i32_0 : i32, i32, i32
  }
}

module attributes {stable_mosaic.version = 11 : i64} {
  func.func @ltm_kernel(%arg0: i32, %arg1: memref<16x32xf32, #tpu.memory_space<vmem>>, %arg2: memref<32x96xbf16, #tpu.memory_space<vmem>>, %arg3: memref<1x96xf32, #tpu.memory_space<vmem>>, %arg4: memref<32x64xbf16, #tpu.memory_space<vmem>>, %arg5: memref<1x64xf32, #tpu.memory_space<vmem>>, %arg6: memref<64x32xbf16, #tpu.memory_space<vmem>>, %arg7: memref<1x32xf32, #tpu.memory_space<vmem>>, %arg8: memref<1x32xf32, #tpu.memory_space<vmem>>, %arg9: memref<16x32xf32, #tpu.memory_space<vmem>>, %arg10: memref<1x1x128xf32, #tpu.memory_space<vmem>>, %arg11: memref<32x32xf32, #tpu.memory_space<vmem>>) attributes {dimension_semantics = [#tpu.dimension_semantics<parallel>], iteration_bounds = array<i64: 1>, scalar_prefetch = 0 : i64, scratch_operands = 1 : i64, tpu.core_type = #tpu.core_type<tc>, window_params = [{transform_indices = @transform_0, window_bounds = array<i64: 16, 32>}, {pipeline_mode = #tpu.pipeline_mode<synchronous>, transform_indices = @transform_1, window_bounds = array<i64: 32, 96>}, {pipeline_mode = #tpu.pipeline_mode<synchronous>, transform_indices = @transform_2, window_bounds = array<i64: 1, 96>}, {pipeline_mode = #tpu.pipeline_mode<synchronous>, transform_indices = @transform_3, window_bounds = array<i64: 32, 64>}, {pipeline_mode = #tpu.pipeline_mode<synchronous>, transform_indices = @transform_4, window_bounds = array<i64: 1, 64>}, {pipeline_mode = #tpu.pipeline_mode<synchronous>, transform_indices = @transform_5, window_bounds = array<i64: 64, 32>}, {pipeline_mode = #tpu.pipeline_mode<synchronous>, transform_indices = @transform_6, window_bounds = array<i64: 1, 32>}, {pipeline_mode = #tpu.pipeline_mode<synchronous>, transform_indices = @transform_7, window_bounds = array<i64: 1, 32>}, {transform_indices = @transform_8, window_bounds = array<i64: 16, 32>}, {transform_indices = @transform_9, window_bounds = array<i64: 1, 1, 128>}]} {
    %c0 = arith.constant 0 : index
    %c0_0 = arith.constant 0 : index
    %0 = vector.load %arg1[%c0, %c0_0] : memref<16x32xf32, #tpu.memory_space<vmem>>, vector<16x32xf32>
    %c0_1 = arith.constant 0 : index
    %c0_2 = arith.constant 0 : index
    %1 = vector.load %arg2[%c0_1, %c0_2] : memref<32x96xbf16, #tpu.memory_space<vmem>>, vector<32x96xbf16>
    %2 = arith.truncf %0 : vector<16x32xf32> to vector<16x32xbf16>
    %cst = arith.constant dense<0.000000e+00> : vector<16x96xf32>
    %3 = tpu.matmul %2, %1, %cst {dimension_numbers = #tpu.dot_dimension_numbers<[1], [0], [0], [1], [0, 0, 1, 1], [], []>} : vector<16x32xbf16>, vector<32x96xbf16>, vector<16x96xf32> -> vector<16x96xf32>
    %c0_3 = arith.constant 0 : index
    %c0_4 = arith.constant 0 : index
    %4 = vector.load %arg3[%c0_3, %c0_4] : memref<1x96xf32, #tpu.memory_space<vmem>>, vector<1x96xf32>
    %5 = vector.broadcast %4 : vector<1x96xf32> to vector<16x96xf32>
    %6 = arith.addf %3, %5 : vector<16x96xf32>
    %7 = vector.extract_strided_slice %6 {offsets = [0, 0], sizes = [16, 32], strides = [1, 1]} : vector<16x96xf32> to vector<16x32xf32>
    %c0_5 = arith.constant 0 : index
    %c0_6 = arith.constant 0 : index
    %8 = vector.load %arg11[%c0_5, %c0_6] : memref<32x32xf32, #tpu.memory_space<vmem>>, vector<16x32xf32>
    tpu.vector_store %arg11[%c0_5, %c0_6], %7 {strides = array<i32>} : memref<32x32xf32, #tpu.memory_space<vmem>>, vector<16x32xf32>,
    %9 = vector.extract_strided_slice %6 {offsets = [0, 32], sizes = [16, 32], strides = [1, 1]} : vector<16x96xf32> to vector<16x32xf32>
    %c16 = arith.constant 16 : index
    %c0_7 = arith.constant 0 : index
    %10 = vector.load %arg11[%c16, %c0_7] : memref<32x32xf32, #tpu.memory_space<vmem>>, vector<16x32xf32>
    tpu.vector_store %arg11[%c16, %c0_7], %9 {strides = array<i32>} : memref<32x32xf32, #tpu.memory_space<vmem>>, vector<16x32xf32>,
    %11 = vector.extract_strided_slice %6 {offsets = [0, 64], sizes = [16, 32], strides = [1, 1]} : vector<16x96xf32> to vector<16x32xf32>
    %c0_8 = arith.constant 0 : index
    %c0_9 = arith.constant 0 : index
    %12 = vector.load %arg4[%c0_8, %c0_9] : memref<32x64xbf16, #tpu.memory_space<vmem>>, vector<32x64xbf16>
    %c0_10 = arith.constant 0 : index
    %c0_11 = arith.constant 0 : index
    %13 = vector.load %arg6[%c0_10, %c0_11] : memref<64x32xbf16, #tpu.memory_space<vmem>>, vector<64x32xbf16>
    %c0_12 = arith.constant 0 : index
    %c0_13 = arith.constant 0 : index
    %14 = vector.load %arg5[%c0_12, %c0_13] : memref<1x64xf32, #tpu.memory_space<vmem>>, vector<1x64xf32>
    %c0_14 = arith.constant 0 : index
    %c0_15 = arith.constant 0 : index
    %15 = vector.load %arg7[%c0_14, %c0_15] : memref<1x32xf32, #tpu.memory_space<vmem>>, vector<1x32xf32>
    %c0_16 = arith.constant 0 : index
    %c0_17 = arith.constant 0 : index
    %16 = vector.load %arg11[%c0_16, %c0_17] : memref<32x32xf32, #tpu.memory_space<vmem>>, vector<32x32xf32>
    %17 = arith.truncf %16 : vector<32x32xf32> to vector<32x32xbf16>
    %cst_18 = arith.constant dense<0.000000e+00> : vector<32x64xf32>
    %18 = tpu.matmul %17, %12, %cst_18 {dimension_numbers = #tpu.dot_dimension_numbers<[1], [0], [0], [1], [0, 0, 1, 1], [], []>} : vector<32x32xbf16>, vector<32x64xbf16>, vector<32x64xf32> -> vector<32x64xf32>
    %19 = vector.broadcast %14 : vector<1x64xf32> to vector<32x64xf32>
    %20 = arith.addf %18, %19 : vector<32x64xf32>
    %21 = arith.negf %20 : vector<32x64xf32>
    %22 = math.exp %21 : vector<32x64xf32>
    %cst_19 = arith.constant 1.000000e+00 : f32
    %23 = vector.broadcast %cst_19 : f32 to vector<32x64xf32>
    %24 = arith.addf %23, %22 : vector<32x64xf32>
    %25 = arith.divf %23, %24 : vector<32x64xf32>
    %26 = arith.mulf %20, %25 : vector<32x64xf32>
    %27 = arith.truncf %26 : vector<32x64xf32> to vector<32x64xbf16>
    %cst_20 = arith.constant dense<0.000000e+00> : vector<32x32xf32>
    %28 = tpu.matmul %27, %13, %cst_20 {dimension_numbers = #tpu.dot_dimension_numbers<[1], [0], [0], [1], [0, 0, 1, 1], [], []>} : vector<32x64xbf16>, vector<64x32xbf16>, vector<32x32xf32> -> vector<32x32xf32>
    %29 = vector.broadcast %15 : vector<1x32xf32> to vector<32x32xf32>
    %30 = arith.addf %28, %29 : vector<32x32xf32>
    %31 = arith.truncf %30 : vector<32x32xf32> to vector<32x32xbf16>
    %cst_21 = arith.constant dense<0.000000e+00> : vector<32x64xf32>
    %32 = tpu.matmul %31, %12, %cst_21 {dimension_numbers = #tpu.dot_dimension_numbers<[1], [0], [0], [1], [0, 0, 1, 1], [], []>} : vector<32x32xbf16>, vector<32x64xbf16>, vector<32x64xf32> -> vector<32x64xf32>
    %33 = vector.broadcast %14 : vector<1x64xf32> to vector<32x64xf32>
    %34 = arith.addf %32, %33 : vector<32x64xf32>
    %35 = arith.negf %34 : vector<32x64xf32>
    %36 = math.exp %35 : vector<32x64xf32>
    %cst_22 = arith.constant 1.000000e+00 : f32
    %37 = vector.broadcast %cst_22 : f32 to vector<32x64xf32>
    %38 = arith.addf %37, %36 : vector<32x64xf32>
    %39 = arith.divf %37, %38 : vector<32x64xf32>
    %40 = arith.mulf %34, %39 : vector<32x64xf32>
    %41 = arith.truncf %40 : vector<32x64xf32> to vector<32x64xbf16>
    %cst_23 = arith.constant dense<0.000000e+00> : vector<32x32xf32>
    %42 = tpu.matmul %41, %13, %cst_23 {dimension_numbers = #tpu.dot_dimension_numbers<[1], [0], [0], [1], [0, 0, 1, 1], [], []>} : vector<32x64xbf16>, vector<64x32xbf16>, vector<32x32xf32> -> vector<32x32xf32>
    %43 = vector.broadcast %15 : vector<1x32xf32> to vector<32x32xf32>
    %44 = arith.addf %42, %43 : vector<32x32xf32>
    %45 = arith.truncf %44 : vector<32x32xf32> to vector<32x32xbf16>
    %cst_24 = arith.constant dense<0.000000e+00> : vector<32x64xf32>
    %46 = tpu.matmul %45, %12, %cst_24 {dimension_numbers = #tpu.dot_dimension_numbers<[1], [0], [0], [1], [0, 0, 1, 1], [], []>} : vector<32x32xbf16>, vector<32x64xbf16>, vector<32x64xf32> -> vector<32x64xf32>
    %47 = vector.broadcast %14 : vector<1x64xf32> to vector<32x64xf32>
    %48 = arith.addf %46, %47 : vector<32x64xf32>
    %49 = arith.negf %48 : vector<32x64xf32>
    %50 = math.exp %49 : vector<32x64xf32>
    %cst_25 = arith.constant 1.000000e+00 : f32
    %51 = vector.broadcast %cst_25 : f32 to vector<32x64xf32>
    %52 = arith.addf %51, %50 : vector<32x64xf32>
    %53 = arith.divf %51, %52 : vector<32x64xf32>
    %54 = arith.mulf %48, %53 : vector<32x64xf32>
    %55 = arith.truncf %54 : vector<32x64xf32> to vector<32x64xbf16>
    %cst_26 = arith.constant dense<0.000000e+00> : vector<32x32xf32>
    %56 = tpu.matmul %55, %13, %cst_26 {dimension_numbers = #tpu.dot_dimension_numbers<[1], [0], [0], [1], [0, 0, 1, 1], [], []>} : vector<32x64xbf16>, vector<64x32xbf16>, vector<32x32xf32> -> vector<32x32xf32>
    %57 = vector.broadcast %15 : vector<1x32xf32> to vector<32x32xf32>
    %58 = arith.addf %56, %57 : vector<32x32xf32>
    %59 = arith.truncf %58 : vector<32x32xf32> to vector<32x32xbf16>
    %cst_27 = arith.constant dense<0.000000e+00> : vector<32x64xf32>
    %60 = tpu.matmul %59, %12, %cst_27 {dimension_numbers = #tpu.dot_dimension_numbers<[1], [0], [0], [1], [0, 0, 1, 1], [], []>} : vector<32x32xbf16>, vector<32x64xbf16>, vector<32x64xf32> -> vector<32x64xf32>
    %61 = vector.broadcast %14 : vector<1x64xf32> to vector<32x64xf32>
    %62 = arith.addf %60, %61 : vector<32x64xf32>
    %63 = arith.negf %62 : vector<32x64xf32>
    %64 = math.exp %63 : vector<32x64xf32>
    %cst_28 = arith.constant 1.000000e+00 : f32
    %65 = vector.broadcast %cst_28 : f32 to vector<32x64xf32>
    %66 = arith.addf %65, %64 : vector<32x64xf32>
    %67 = arith.divf %65, %66 : vector<32x64xf32>
    %68 = arith.mulf %62, %67 : vector<32x64xf32>
    %69 = arith.truncf %68 : vector<32x64xf32> to vector<32x64xbf16>
    %cst_29 = arith.constant dense<0.000000e+00> : vector<32x32xf32>
    %70 = tpu.matmul %69, %13, %cst_29 {dimension_numbers = #tpu.dot_dimension_numbers<[1], [0], [0], [1], [0, 0, 1, 1], [], []>} : vector<32x64xbf16>, vector<64x32xbf16>, vector<32x32xf32> -> vector<32x32xf32>
    %71 = vector.broadcast %15 : vector<1x32xf32> to vector<32x32xf32>
    %72 = arith.addf %70, %71 : vector<32x32xf32>
    %c0_30 = arith.constant 0 : index
    %c0_31 = arith.constant 0 : index
    %73 = vector.load %arg11[%c0_30, %c0_31] : memref<32x32xf32, #tpu.memory_space<vmem>>, vector<32x32xf32>
    tpu.vector_store %arg11[%c0_30, %c0_31], %72 {strides = array<i32>} : memref<32x32xf32, #tpu.memory_space<vmem>>, vector<32x32xf32>,
    %c0_32 = arith.constant 0 : index
    %c0_33 = arith.constant 0 : index
    %74 = vector.load %arg11[%c0_32, %c0_33] : memref<32x32xf32, #tpu.memory_space<vmem>>, vector<16x32xf32>
    %c16_34 = arith.constant 16 : index
    %c0_35 = arith.constant 0 : index
    %75 = vector.load %arg11[%c16_34, %c0_35] : memref<32x32xf32, #tpu.memory_space<vmem>>, vector<16x32xf32>
    %76 = arith.mulf %74, %74 : vector<16x32xf32>
    %cst_36 = arith.constant dense<0.000000e+00> : vector<16xf32>
    %77 = vector.multi_reduction <add>, %76, %cst_36 [1] : vector<16x32xf32> to vector<16xf32>
    %78 = vector.shape_cast %77 : vector<16xf32> to vector<16x1xf32>
    %cst_37 = arith.constant 3.200000e+01 : f32
    %79 = vector.broadcast %cst_37 : f32 to vector<16x1xf32>
    %80 = arith.divf %78, %79 : vector<16x1xf32>
    %cst_38 = arith.constant 2.000000e-02 : f32
    %81 = vector.broadcast %cst_38 : f32 to vector<16x1xf32>
    %82 = arith.addf %80, %81 : vector<16x1xf32>
    %83 = math.rsqrt %82 : vector<16x1xf32>
    %84 = vector.broadcast %83 : vector<16x1xf32> to vector<16x32xf32>
    %85 = arith.mulf %74, %84 : vector<16x32xf32>
    %c0_39 = arith.constant 0 : index
    %c0_40 = arith.constant 0 : index
    %86 = vector.load %arg8[%c0_39, %c0_40] : memref<1x32xf32, #tpu.memory_space<vmem>>, vector<1x32xf32>
    %87 = vector.broadcast %86 : vector<1x32xf32> to vector<16x32xf32>
    %88 = arith.mulf %85, %87 : vector<16x32xf32>
    %c0_41 = arith.constant 0 : index
    %c0_42 = arith.constant 0 : index
    %89 = vector.load %arg9[%c0_41, %c0_42] : memref<16x32xf32, #tpu.memory_space<vmem>>, vector<16x32xf32>
    tpu.vector_store %arg9[%c0_41, %c0_42], %88 {strides = array<i32>} : memref<16x32xf32, #tpu.memory_space<vmem>>, vector<16x32xf32>,
    %90 = arith.subf %75, %11 : vector<16x32xf32>
    %91 = arith.mulf %90, %90 : vector<16x32xf32>
    %92 = vector.shape_cast %91 : vector<16x32xf32> to vector<1x16x32xf32>
    %cst_43 = arith.constant dense<0.000000e+00> : vector<1xf32>
    %93 = vector.multi_reduction <add>, %92, %cst_43 [1, 2] : vector<1x16x32xf32> to vector<1xf32>
    %94 = vector.shape_cast %93 : vector<1xf32> to vector<1x1x1xf32>
    %95 = vector.extract %94[0, 0, 0] : f32 from vector<1x1x1xf32>
    %96 = vector.broadcast %95 : f32 to vector<1x1x128xf32>
    %c0_44 = arith.constant 0 : index
    %c0_45 = arith.constant 0 : index
    %c0_46 = arith.constant 0 : index
    %97 = vector.load %arg10[%c0_44, %c0_45, %c0_46] : memref<1x1x128xf32, #tpu.memory_space<vmem>>, vector<1x1x128xf32>
    tpu.vector_store %arg10[%c0_44, %c0_45, %c0_46], %96 {strides = array<i32>} : memref<1x1x128xf32, #tpu.memory_space<vmem>>, vector<1x1x128xf32>,
    return
  }
  func.func @transform_0(%arg0: i32) -> (i32, i32) {
    %c0_i32 = arith.constant 0 : i32
    %c0_i32_0 = arith.constant 0 : i32
    return %arg0, %c0_i32 : i32, i32
  }
  func.func @transform_1(%arg0: i32) -> (i32, i32) {
    %c0_i32 = arith.constant 0 : i32
    %c0_i32_0 = arith.constant 0 : i32
    %c0_i32_1 = arith.constant 0 : i32
    return %c0_i32, %c0_i32_0 : i32, i32
  }
  func.func @transform_2(%arg0: i32) -> (i32, i32) {
    %c0_i32 = arith.constant 0 : i32
    %c0_i32_0 = arith.constant 0 : i32
    %c0_i32_1 = arith.constant 0 : i32
    return %c0_i32, %c0_i32_0 : i32, i32
  }
  func.func @transform_3(%arg0: i32) -> (i32, i32) {
    %c0_i32 = arith.constant 0 : i32
    %c0_i32_0 = arith.constant 0 : i32
    %c0_i32_1 = arith.constant 0 : i32
    return %c0_i32, %c0_i32_0 : i32, i32
  }
  func.func @transform_4(%arg0: i32) -> (i32, i32) {
    %c0_i32 = arith.constant 0 : i32
    %c0_i32_0 = arith.constant 0 : i32
    %c0_i32_1 = arith.constant 0 : i32
    return %c0_i32, %c0_i32_0 : i32, i32
  }
  func.func @transform_5(%arg0: i32) -> (i32, i32) {
    %c0_i32 = arith.constant 0 : i32
    %c0_i32_0 = arith.constant 0 : i32
    %c0_i32_1 = arith.constant 0 : i32
    return %c0_i32, %c0_i32_0 : i32, i32
  }
  func.func @transform_6(%arg0: i32) -> (i32, i32) {
    %c0_i32 = arith.constant 0 : i32
    %c0_i32_0 = arith.constant 0 : i32
    %c0_i32_1 = arith.constant 0 : i32
    return %c0_i32, %c0_i32_0 : i32, i32
  }
  func.func @transform_7(%arg0: i32) -> (i32, i32) {
    %c0_i32 = arith.constant 0 : i32
    %c0_i32_0 = arith.constant 0 : i32
    %c0_i32_1 = arith.constant 0 : i32
    return %c0_i32, %c0_i32_0 : i32, i32
  }
  func.func @transform_8(%arg0: i32) -> (i32, i32) {
    %c0_i32 = arith.constant 0 : i32
    %c0_i32_0 = arith.constant 0 : i32
    return %arg0, %c0_i32 : i32, i32
  }
  func.func @transform_9(%arg0: i32) -> (i32, i32, i32) {
    %c0_i32 = arith.constant 0 : i32
    %c0_i32_0 = arith.constant 0 : i32
    %c0_i32_1 = arith.constant 0 : i32
    return %arg0, %c0_i32, %c0_i32_0 : i32, i32, i32
  }
}

</mosaic_0001>

<bundles_post_ra>
// kernel: tpu_custom_call.1
= control target key start
LH: loop header
LB: loop body
LE: loop exit
PB: predicated region body
PF: predicated region fallthrough
CT: control target
= control target key end

     0   :  { %15 = vsyncpa [#allocation4], 0  ;;  %s1179_s0 = inlined_call_operand.vmem [shape: f32[16,32], index: 0, kind: input, shape index: {}]   ;;  %s1180_s1 = inlined_call_operand.vmem [shape: bf16[32,96], index: 1, kind: input, shape index: {}]   ;;  %s1181_s2 = inlined_call_operand.vmem [shape: f32[1,96], index: 2, kind: input, shape index: {}]   ;;  %s1182_s3 = inlined_call_operand.vmem [shape: bf16[32,64], index: 3, kind: input, shape index: {}]   ;;  %s1183_s4 = inlined_call_operand.vmem [shape: f32[1,64], index: 4, kind: input, shape index: {}]   ;;  %s1184_s5 = inlined_call_operand.vmem [shape: bf16[64,32], index: 5, kind: input, shape index: {}]   ;;  %s1185_s6 = inlined_call_operand.vmem [shape: f32[1,32], index: 6, kind: input, shape index: {}]   ;;  %s1186_s7 = inlined_call_operand.vmem [shape: f32[1,32], index: 7, kind: input, shape index: {}]   ;;  %s1187_s8 = inlined_call_operand.hbm [shape: f32[16,32], index: 8, kind: output, shape index: {0}]   ;;  %s1188_s9 = inlined_call_operand.hbm [shape: f32[1,1,128], index: 9, kind: output, shape index: {1}]  }
   0x1   :  { %v865_v0 = vld [vmem:[%s1180_s1 + $0x8] sm:$0xff]  ;;  %v864_v1 = vld [vmem:[%s1180_s1] sm:$0xff] }
   0x2   :  { %v34_v2 = vld [vmem:[%s1179_s0] sm:$0xff]  ;;  %v35_v3 = vld [vmem:[%s1179_s0 + $0x8] sm:$0xff]  ;;  %67 = vmatpush.bf16.msra.mxu0 %v865_v0 }
   0x3   :  { %16 = vsyncpa [#allocation6], 0  ;;  %v40_v4 = vpack.c.bf16 %v35_v3, %v34_v2  ;;  %vm57_vm0 = vcmask 261120   ;;  %v867_v5 = vld [vmem:[%s1182_s3 + $0x8] sm:$0xff]  ;;  %v866_v6 = vld [vmem:[%s1182_s3] sm:$0xff]  ;;  %s1007_s21 = smov 64  }
   0x4   :  { %134 = vmatpush.bf16.msra.mxu1 %v867_v5  ;;  %296 = vmatpush.bf16.msra.mxu3 %v867_v5  ;;  %v881_v7 = vld [vmem:[%s1181_s2] ss:$0 sm:$0xff]  ;;  %s1008_s22 = smov 96   ;;  %v871_v20 = vld [vmem:[%s1184_s5 + $0x18] sm:$0xff]  ;;  %v870_v22 = vld [vmem:[%s1184_s5 + $0x10] sm:$0xff]  ;;  %vm256_vm9 = vcmask 523264  }
   0x5   :  { %267 = vmatpush.bf16.msra.mxu2 %v871_v20  ;;  %v1098_v21 = vld [vmem:[%s1183_s4] ss:$0 sm:$0xff]  ;;  %v869_v25 = vld [vmem:[%s1184_s5 + $0x8] sm:$0xff]  ;;  %s771_s14 = sshll.u32 %s1187_s8, 4  ;;  %s1011_s15 = smov 128   ;;  %s772_s14 = int_to_ptr.hbm [resolvable:$true] %s771_s14 }
   0x6   :  { %68 = vmatpush.bf16.msra.mxu0 %v864_v1  ;;  %v868_v27 = vld [vmem:[%s1184_s5] sm:$0xff]  ;;  %s1012_s16 = smov 8   ;;  %s1013_s17 = smov [#allocation5]  }
   0x7   :  { %s783_s18 = sshll.u32 %s1013_s17, 4  ;;  %s785_s0 = sshll.u32 %s1188_s9, 4  ;;  %s784_s18 = int_to_ptr.vmem [resolvable:$true] %s783_s18  ;;  %s786_s0 = int_to_ptr.hbm [resolvable:$true] %s785_s0 }
   0x8   :  { %135 = vmatpush.bf16.msra.mxu1 %v866_v6  ;;  %297 = vmatpush.bf16.msra.mxu3 %v866_v6 }
   0x9   :  { %807 = vmatmul.msk.bf16.vlgmr.msra.gmra.mxu0 %vm57_vm0, %v40_v4  ;;  %268 = vmatpush.bf16.msra.mxu2 %v870_v22 }
   0xa   :  { %401 = vmatpush.bf16.msrb.mxu0 %v871_v20 }
   0xc   :  { %430 = vmatpush.bf16.msrb.mxu1 %v867_v5  ;;  %535 = vmatpush.bf16.msrb.mxu3 %v871_v20 }
   0xd   :  { %269 = vmatpush.bf16.msra.mxu2 %v869_v25 }
   0xe   :  { %402 = vmatpush.bf16.msrb.mxu0 %v870_v22 }
  0x10   :  { %431 = vmatpush.bf16.msrb.mxu1 %v866_v6  ;;  %536 = vmatpush.bf16.msrb.mxu3 %v870_v22 }
  0x11   :  { %270 = vmatpush.bf16.msra.mxu2 %v868_v27 }
  0x12   :  { %403 = vmatpush.bf16.msrb.mxu0 %v869_v25 }
  0x14   :  { %537 = vmatpush.bf16.msrb.mxu3 %v869_v25 }
  0x15   :  { %564 = vmatpush.bf16.msrb.mxu2 %v867_v5 }
  0x16   :  { %404 = vmatpush.bf16.msrb.mxu0 %v868_v27 }
  0x18   :  { %538 = vmatpush.bf16.msrb.mxu3 %v868_v27 }
  0x19   :  { %565 = vmatpush.bf16.msrb.mxu2 %v866_v6 }
  0x1a   :  { %669 = vmatpush.bf16.msra.mxu0 %v871_v20 }
  0x1e   :  { %670 = vmatpush.bf16.msra.mxu0 %v870_v22 }
  0x22   :  { %671 = vmatpush.bf16.msra.mxu0 %v869_v25 }
  0x26   :  { %672 = vmatpush.bf16.msra.mxu0 %v868_v27 }
  0x86   :  { %v70_v8 = vpop.f32.mrf.mxu0 }
  0x87   :  { %v71_v9 = vadd.f32 %v881_v7, %v70_v8 }
  0x89   :  { %75 = vst.msk [vmem:[#allocation2] sm:$0xff] %vm57_vm0, %v71_v9  ;;  %741 = vrot.lane.b32.xlu1 %v71_v9, %s1007_s21  ;;  %79 = vrot.lane.b32.xlu0 %v71_v9, %s1008_s22 }
  0x8e   :  { %v72_v10 = vpop.f32.mrf.mxu0 }
  0x8f   :  { %v73_v11 = vadd.f32 %v881_v7, %v72_v10 }
  0x90   :  { %v101_v12 = vld [vmem:[#allocation2] sm:$0xff] }
  0x91   :  { %76 = vst.msk [vmem:[#allocation2 + $0x8] sm:$0xff] %vm57_vm0, %v73_v11  ;;  %743 = vrot.lane.b32.xlu1 %v73_v11, %s1007_s21  ;;  %81 = vrot.lane.b32.xlu0 %v73_v11, %s1008_s22 }
  0x98   :  { %v102_v13 = vld [vmem:[#allocation2 + $0x8] sm:$0xff] }
  0x99   :  { %v105_v14 = vpack.c.bf16 %v102_v13, %v101_v12 }
  0x9b   :  { %816 = vmatmul.msk.bf16.vlgmr.msra.gmra.mxu1 %vm57_vm0, %v105_v14 }
  0xfb   :  { %v80_v15 = vpop.permute.xlu0 %79 }
  0xfc   :  { %85 = vst.msk [vmem:[#allocation2 + $0x10] sm:$0xff] %vm57_vm0, %v80_v15 }
 0x103   :  { %v82_v16 = vpop.permute.xlu0 %81  ;;  %v103_v17 = vld [vmem:[#allocation2 + $0x10] sm:$0xff] }
 0x104   :  { %86 = vst.msk [vmem:[#allocation2 + $0x18] sm:$0xff] %vm57_vm0, %v82_v16 }
 0x10b   :  { %v104_v18 = vld [vmem:[#allocation2 + $0x18] sm:$0xff] }
 0x10c   :  { %v106_v19 = vpack.c.bf16 %v104_v18, %v103_v17 }
 0x10e   :  { %817 = vmatmul.msk.bf16.gmra.mxu1 %vm57_vm0, %v106_v19 }
 0x118   :  { %v137_v23 = vpop.f32.mrf.mxu1 }
 0x119   :  { %v138_v24 = vadd.f32 %v1098_v21, %v137_v23 }
 0x11b   :  { %v818_v26 = vmul.f32 -1.442695, %v138_v24 }
 0x11d   :  { %885 = vpow2.f32 %v818_v26 }
 0x120   :  { %v139_v28 = vpop.f32.mrf.mxu1 }
 0x121   :  { %v140_v29 = vadd.f32 %v1098_v21, %v139_v28 }
 0x123   :  { %v886_v30 = vpop.eup %885  ;;  %v819_v31 = vmul.f32 -1.442695, %v140_v29 }
 0x124   :  { %v159_v32 = vadd.f32 1.0, %v886_v30 }
 0x125   :  { %887 = vpow2.f32 %v819_v31 }
 0x126   :  { %889 = vrcp.f32 %v159_v32  ;;  %v174_v42 = vand.u32 2147483648, %v159_v32  ;;  %vm168_vm2 = vweird.f32 %v159_v32  ;;  %v172_v43 = vand.u32 2147483647, %v159_v32 }
 0x128   :  { %v175_v49 = vor.u32 1.1754944e-38, %v174_v42  ;;  %vm173_vm5 = vcmp.eq.f32.partialorder %v172_v43, 8.507059e+37 }
 0x12b   :  { %v888_v33 = vpop.eup %887 }
 0x12c   :  { %v890_v34 = vpop.eup %889  ;;  %v160_v35 = vadd.f32 1.0, %v888_v33 }
 0x12d   :  { %v164_v36 = vmul.f32 %v890_v34, %v159_v32  ;;  %vm169_vm1 = vweird.f32 %v890_v34 }
 0x12e   :  { %891 = vrcp.f32 %v160_v35  ;;  %vm170_vm3 = vmor %vm168_vm2, %vm169_vm1  ;;  %v189_v45 = vand.u32 2147483648, %v160_v35  ;;  %v187_v48 = vand.u32 2147483647, %v160_v35  ;;  %vm183_vm6 = vweird.f32 %v160_v35 }
 0x12f   :  { %v165_v37 = vsub.f32 1.0, %v164_v36 }
 0x130   :  { %v190_v52 = vor.u32 1.1754944e-38, %v189_v45  ;;  %vm188_vm8 = vcmp.eq.f32.partialorder %v187_v48, 8.507059e+37 }
 0x131   :  { %v166_v38 = vmul.f32 %v890_v34, %v165_v37 }
 0x133   :  { %v167_v40 = vadd.f32 %v890_v34, %v166_v38 }
 0x134   :  { %v892_v39 = vpop.eup %891 }
 0x135   :  { %v179_v41 = vmul.f32 %v892_v39, %v160_v35  ;;  %v171_v46 = vsel %vm170_vm3, %v890_v34, %v167_v40  ;;  %vm184_vm4 = vweird.f32 %v892_v39 }
 0x136   :  { %v176_v51 = vsel %vm173_vm5, %v175_v49, %v171_v46  ;;  %vm185_vm7 = vmor %vm183_vm6, %vm184_vm4 }
 0x137   :  { %v180_v44 = vsub.f32 1.0, %v179_v41  ;;  %v223_v55 = vmul.f32 %v176_v51, %v138_v24 }
 0x139   :  { %v181_v47 = vmul.f32 %v892_v39, %v180_v44 }
 0x13b   :  { %v182_v50 = vadd.f32 %v892_v39, %v181_v47 }
 0x13d   :  { %v186_v53 = vsel %vm185_vm7, %v892_v39, %v182_v50 }
 0x13e   :  { %v191_v54 = vsel %vm188_vm8, %v190_v52, %v186_v53 }
 0x13f   :  { %v224_v56 = vmul.f32 %v191_v54, %v140_v29  ;;  %v1118_v29 = vld [vmem:[%s1185_s6] ss:$0 sm:$0xff] }
 0x141   :  { %v227_v57 = vpack.c.bf16 %v224_v56, %v223_v55 }
 0x143   :  { %838 = vmatmul.msk.bf16.vlgmr.msra.gmra.mxu2 %vm256_vm9, %v227_v57 }
 0x18b   :  { %v142_v58 = vpop.f32.mrf.mxu1 }
 0x18c   :  { %v143_v59 = vadd.f32 %v1098_v21, %v142_v58 }
 0x18e   :  { %v820_v60 = vmul.f32 -1.442695, %v143_v59 }
 0x190   :  { %893 = vpow2.f32 %v820_v60 }
 0x193   :  { %v144_v61 = vpop.f32.mrf.mxu1 }
 0x194   :  { %v145_v62 = vadd.f32 %v1098_v21, %v144_v61 }
 0x196   :  { %v894_v63 = vpop.eup %893  ;;  %v821_v0 = vmul.f32 -1.442695, %v145_v62 }
 0x197   :  { %v161_v1 = vadd.f32 1.0, %v894_v63 }
 0x198   :  { %895 = vpow2.f32 %v821_v0 }
 0x199   :  { %897 = vrcp.f32 %v161_v1  ;;  %v204_v11 = vand.u32 2147483648, %v161_v1  ;;  %vm198_vm11 = vweird.f32 %v161_v1  ;;  %v202_v12 = vand.u32 2147483647, %v161_v1 }
 0x19b   :  { %v205_v18 = vor.u32 1.1754944e-38, %v204_v11  ;;  %vm203_vm14 = vcmp.eq.f32.partialorder %v202_v12, 8.507059e+37 }
 0x19e   :  { %v896_v2 = vpop.eup %895 }
 0x19f   :  { %v898_v3 = vpop.eup %897  ;;  %v162_v4 = vadd.f32 1.0, %v896_v2 }
 0x1a0   :  { %v194_v5 = vmul.f32 %v898_v3, %v161_v1  ;;  %vm199_vm10 = vweird.f32 %v898_v3 }
 0x1a1   :  { %899 = vrcp.f32 %v162_v4  ;;  %vm200_vm12 = vmor %vm198_vm11, %vm199_vm10  ;;  %v219_v14 = vand.u32 2147483648, %v162_v4  ;;  %v217_v17 = vand.u32 2147483647, %v162_v4  ;;  %vm213_vm15 = vweird.f32 %v162_v4 }
 0x1a2   :  { %v195_v6 = vsub.f32 1.0, %v194_v5 }
 0x1a3   :  { %v220_v22 = vor.u32 1.1754944e-38, %v219_v14  ;;  %vm218_vm2 = vcmp.eq.f32.partialorder %v217_v17, 8.507059e+37 }
 0x1a4   :  { %v196_v7 = vmul.f32 %v898_v3, %v195_v6 }
 0x1a6   :  { %v197_v9 = vadd.f32 %v898_v3, %v196_v7 }
 0x1a7   :  { %v900_v8 = vpop.eup %899 }
 0x1a8   :  { %v209_v10 = vmul.f32 %v900_v8, %v162_v4  ;;  %v201_v15 = vsel %vm200_vm12, %v898_v3, %v197_v9  ;;  %vm214_vm13 = vweird.f32 %v900_v8 }
 0x1a9   :  { %v206_v20 = vsel %vm203_vm14, %v205_v18, %v201_v15  ;;  %vm215_vm1 = vmor %vm213_vm15, %vm214_vm13 }
 0x1aa   :  { %v210_v13 = vsub.f32 1.0, %v209_v10  ;;  %v225_v25 = vmul.f32 %v206_v20, %v143_v59 }
 0x1ac   :  { %v211_v16 = vmul.f32 %v900_v8, %v210_v13 }
 0x1ae   :  { %v212_v19 = vadd.f32 %v900_v8, %v211_v16 }
 0x1b0   :  { %v216_v23 = vsel %vm215_vm1, %v900_v8, %v212_v19 }
 0x1b1   :  { %v221_v24 = vsel %vm218_vm2, %v220_v22, %v216_v23 }
 0x1b2   :  { %v226_v26 = vmul.f32 %v221_v24, %v145_v62 }
 0x1b4   :  { %v228_v27 = vpack.c.bf16 %v226_v26, %v225_v25 }
 0x1b6   :  { %839 = vmatmul.msk.bf16.gmra.mxu2 %vm256_vm9, %v228_v27 }
 0x1c6   :  { %v272_v28 = vpop.f32.mrf.mxu2 }
 0x1c7   :  { %v273_v31 = vadd.f32 %v1118_v29, %v272_v28 }
 0x1ce   :  { %v274_v30 = vpop.f32.mrf.mxu2 }
 0x1cf   :  { %v275_v32 = vadd.f32 %v1118_v29, %v274_v30 }
 0x1d1   :  { %v282_v33 = vpack.c.bf16 %v275_v32, %v273_v31 }
 0x1d3   :  { %840 = vmatmul.msk.bf16.vlgmr.msra.gmra.mxu3 %vm57_vm0, %v282_v33 }
 0x239   :  { %v277_v34 = vpop.f32.mrf.mxu2 }
 0x23a   :  { %v278_v36 = vadd.f32 %v1118_v29, %v277_v34 }
 0x241   :  { %v279_v35 = vpop.f32.mrf.mxu2 }
 0x242   :  { %v280_v37 = vadd.f32 %v1118_v29, %v279_v35 }
 0x244   :  { %v283_v38 = vpack.c.bf16 %v280_v37, %v278_v36 }
 0x246   :  { %841 = vmatmul.msk.bf16.gmra.mxu3 %vm57_vm0, %v283_v38 }
 0x256   :  { %v299_v39 = vpop.f32.mrf.mxu3 }
 0x257   :  { %v300_v40 = vadd.f32 %v1098_v21, %v299_v39 }
 0x259   :  { %v842_v41 = vmul.f32 -1.442695, %v300_v40 }
 0x25b   :  { %901 = vpow2.f32 %v842_v41 }
 0x25e   :  { %v301_v42 = vpop.f32.mrf.mxu3 }
 0x25f   :  { %v302_v43 = vadd.f32 %v1098_v21, %v301_v42 }
 0x261   :  { %v902_v44 = vpop.eup %901  ;;  %v843_v45 = vmul.f32 -1.442695, %v302_v43 }
 0x262   :  { %v321_v46 = vadd.f32 1.0, %v902_v44 }
 0x263   :  { %903 = vpow2.f32 %v843_v45 }
 0x264   :  { %905 = vrcp.f32 %v321_v46  ;;  %v336_v56 = vand.u32 2147483648, %v321_v46  ;;  %vm330_vm4 = vweird.f32 %v321_v46  ;;  %v334_v57 = vand.u32 2147483647, %v321_v46 }
 0x266   :  { %v337_v63 = vor.u32 1.1754944e-38, %v336_v56  ;;  %vm335_vm7 = vcmp.eq.f32.partialorder %v334_v57, 8.507059e+37 }
 0x269   :  { %v904_v47 = vpop.eup %903 }
 0x26a   :  { %v906_v48 = vpop.eup %905  ;;  %v322_v49 = vadd.f32 1.0, %v904_v47 }
 0x26b   :  { %v326_v50 = vmul.f32 %v906_v48, %v321_v46  ;;  %vm331_vm3 = vweird.f32 %v906_v48 }
 0x26c   :  { %907 = vrcp.f32 %v322_v49  ;;  %vm332_vm5 = vmor %vm330_vm4, %vm331_vm3  ;;  %v351_v59 = vand.u32 2147483648, %v322_v49  ;;  %v349_v62 = vand.u32 2147483647, %v322_v49  ;;  %vm345_vm8 = vweird.f32 %v322_v49 }
 0x26d   :  { %v327_v51 = vsub.f32 1.0, %v326_v50 }
 0x26e   :  { %v352_v2 = vor.u32 1.1754944e-38, %v351_v59  ;;  %vm350_vm11 = vcmp.eq.f32.partialorder %v349_v62, 8.507059e+37 }
 0x26f   :  { %v328_v52 = vmul.f32 %v906_v48, %v327_v51 }
 0x271   :  { %v329_v54 = vadd.f32 %v906_v48, %v328_v52 }
 0x272   :  { %v908_v53 = vpop.eup %907 }
 0x273   :  { %v341_v55 = vmul.f32 %v908_v53, %v322_v49  ;;  %v333_v60 = vsel %vm332_vm5, %v906_v48, %v329_v54  ;;  %vm346_vm6 = vweird.f32 %v908_v53 }
 0x274   :  { %v338_v1 = vsel %vm335_vm7, %v337_v63, %v333_v60  ;;  %vm347_vm10 = vmor %vm345_vm8, %vm346_vm6 }
 0x275   :  { %v342_v58 = vsub.f32 1.0, %v341_v55  ;;  %v385_v5 = vmul.f32 %v338_v1, %v300_v40 }
 0x277   :  { %v343_v61 = vmul.f32 %v908_v53, %v342_v58 }
 0x279   :  { %v344_v0 = vadd.f32 %v908_v53, %v343_v61 }
 0x27b   :  { %v348_v3 = vsel %vm347_vm10, %v908_v53, %v344_v0 }
 0x27c   :  { %v353_v4 = vsel %vm350_vm11, %v352_v2, %v348_v3 }
 0x27d   :  { %v386_v6 = vmul.f32 %v353_v4, %v302_v43 }
 0x27f   :  { %v389_v7 = vpack.c.bf16 %v386_v6, %v385_v5 }
 0x281   :  { %846 = vmatmul.msk.bf16.vlgmr.msrb.gmra.mxu0 %vm256_vm9, %v389_v7 }
 0x2c9   :  { %v304_v8 = vpop.f32.mrf.mxu3 }
 0x2ca   :  { %v305_v9 = vadd.f32 %v1098_v21, %v304_v8 }
 0x2cc   :  { %v844_v10 = vmul.f32 -1.442695, %v305_v9 }
 0x2ce   :  { %909 = vpow2.f32 %v844_v10 }
 0x2d1   :  { %v306_v11 = vpop.f32.mrf.mxu3 }
 0x2d2   :  { %v307_v12 = vadd.f32 %v1098_v21, %v306_v11 }
 0x2d4   :  { %v910_v13 = vpop.eup %909  ;;  %v845_v14 = vmul.f32 -1.442695, %v307_v12 }
 0x2d5   :  { %v323_v15 = vadd.f32 1.0, %v910_v13 }
 0x2d6   :  { %911 = vpow2.f32 %v845_v14 }
 0x2d7   :  { %913 = vrcp.f32 %v323_v15  ;;  %v366_v26 = vand.u32 2147483648, %v323_v15  ;;  %vm360_vm13 = vweird.f32 %v323_v15  ;;  %v364_v27 = vand.u32 2147483647, %v323_v15 }
 0x2d9   :  { %v367_v34 = vor.u32 1.1754944e-38, %v366_v26  ;;  %vm365_vm1 = vcmp.eq.f32.partialorder %v364_v27, 8.507059e+37 }
 0x2dc   :  { %v912_v16 = vpop.eup %911 }
 0x2dd   :  { %v914_v17 = vpop.eup %913  ;;  %v324_v18 = vadd.f32 1.0, %v912_v16 }
 0x2de   :  { %v356_v19 = vmul.f32 %v914_v17, %v323_v15  ;;  %vm361_vm12 = vweird.f32 %v914_v17 }
 0x2df   :  { %915 = vrcp.f32 %v324_v18  ;;  %vm362_vm14 = vmor %vm360_vm13, %vm361_vm12  ;;  %v381_v30 = vand.u32 2147483648, %v324_v18  ;;  %v379_v33 = vand.u32 2147483647, %v324_v18  ;;  %vm375_vm2 = vweird.f32 %v324_v18 }
 0x2e0   :  { %v357_v20 = vsub.f32 1.0, %v356_v19 }
 0x2e1   :  { %v382_v37 = vor.u32 1.1754944e-38, %v381_v30  ;;  %vm380_vm4 = vcmp.eq.f32.partialorder %v379_v33, 8.507059e+37 }
 0x2e2   :  { %v358_v22 = vmul.f32 %v914_v17, %v357_v20 }
 0x2e4   :  { %v359_v24 = vadd.f32 %v914_v17, %v358_v22 }
 0x2e5   :  { %v916_v23 = vpop.eup %915 }
 0x2e6   :  { %v371_v25 = vmul.f32 %v916_v23, %v324_v18  ;;  %v363_v31 = vsel %vm362_vm14, %v914_v17, %v359_v24  ;;  %vm376_vm15 = vweird.f32 %v916_v23 }
 0x2e7   :  { %v368_v36 = vsel %vm365_vm1, %v367_v34, %v363_v31  ;;  %vm377_vm3 = vmor %vm375_vm2, %vm376_vm15 }
 0x2e8   :  { %v372_v28 = vsub.f32 1.0, %v371_v25  ;;  %v387_v40 = vmul.f32 %v368_v36, %v305_v9 }
 0x2ea   :  { %v373_v32 = vmul.f32 %v916_v23, %v372_v28 }
 0x2ec   :  { %v374_v35 = vadd.f32 %v916_v23, %v373_v32 }
 0x2ee   :  { %v378_v38 = vsel %vm377_vm3, %v916_v23, %v374_v35 }
 0x2ef   :  { %v383_v39 = vsel %vm380_vm4, %v382_v37, %v378_v38 }
 0x2f0   :  { %v388_v41 = vmul.f32 %v383_v39, %v307_v12 }
 0x2f2   :  { %v390_v42 = vpack.c.bf16 %v388_v41, %v387_v40 }
 0x2f4   :  { %847 = vmatmul.msk.bf16.gmra.mxu0 %vm256_vm9, %v390_v42 }
 0x2fe   :  { %v406_v43 = vpop.f32.mrf.mxu0 }
 0x2ff   :  { %v407_v45 = vadd.f32 %v1118_v29, %v406_v43 }
 0x306   :  { %v408_v44 = vpop.f32.mrf.mxu0 }
 0x307   :  { %v409_v46 = vadd.f32 %v1118_v29, %v408_v44 }
 0x309   :  { %v416_v47 = vpack.c.bf16 %v409_v46, %v407_v45 }
 0x30b   :  { %848 = vmatmul.msk.bf16.vlgmr.msrb.gmra.mxu1 %vm57_vm0, %v416_v47 }
 0x371   :  { %v411_v48 = vpop.f32.mrf.mxu0 }
 0x372   :  { %v412_v50 = vadd.f32 %v1118_v29, %v411_v48 }
 0x379   :  { %v413_v49 = vpop.f32.mrf.mxu0 }
 0x37a   :  { %v414_v51 = vadd.f32 %v1118_v29, %v413_v49 }
 0x37c   :  { %v417_v52 = vpack.c.bf16 %v414_v51, %v412_v50 }
 0x37e   :  { %849 = vmatmul.msk.bf16.gmra.mxu1 %vm57_vm0, %v417_v52 }
 0x388   :  { %v433_v53 = vpop.f32.mrf.mxu1 }
 0x389   :  { %v434_v54 = vadd.f32 %v1098_v21, %v433_v53 }
 0x38b   :  { %v850_v55 = vmul.f32 -1.442695, %v434_v54 }
 0x38d   :  { %917 = vpow2.f32 %v850_v55 }
 0x390   :  { %v435_v56 = vpop.f32.mrf.mxu1 }
 0x391   :  { %v436_v57 = vadd.f32 %v1098_v21, %v435_v56 }
 0x393   :  { %v918_v58 = vpop.eup %917  ;;  %v851_v59 = vmul.f32 -1.442695, %v436_v57 }
 0x394   :  { %v455_v60 = vadd.f32 1.0, %v918_v58 }
 0x395   :  { %919 = vpow2.f32 %v851_v59 }
 0x396   :  { %921 = vrcp.f32 %v455_v60  ;;  %v470_v6 = vand.u32 2147483648, %v455_v60  ;;  %vm464_vm6 = vweird.f32 %v455_v60  ;;  %v468_v7 = vand.u32 2147483647, %v455_v60 }
 0x398   :  { %v471_v13 = vor.u32 1.1754944e-38, %v470_v6  ;;  %vm469_vm10 = vcmp.eq.f32.partialorder %v468_v7, 8.507059e+37 }
 0x39b   :  { %v920_v61 = vpop.eup %919 }
 0x39c   :  { %v922_v62 = vpop.eup %921  ;;  %v456_v63 = vadd.f32 1.0, %v920_v61 }
 0x39d   :  { %v460_v0 = vmul.f32 %v922_v62, %v455_v60  ;;  %vm465_vm5 = vweird.f32 %v922_v62 }
 0x39e   :  { %923 = vrcp.f32 %v456_v63  ;;  %vm466_vm7 = vmor %vm464_vm6, %vm465_vm5  ;;  %v485_v9 = vand.u32 2147483648, %v456_v63  ;;  %v483_v12 = vand.u32 2147483647, %v456_v63  ;;  %vm479_vm11 = vweird.f32 %v456_v63 }
 0x39f   :  { %v461_v1 = vsub.f32 1.0, %v460_v0 }
 0x3a0   :  { %v486_v16 = vor.u32 1.1754944e-38, %v485_v9  ;;  %vm484_vm13 = vcmp.eq.f32.partialorder %v483_v12, 8.507059e+37 }
 0x3a1   :  { %v462_v2 = vmul.f32 %v922_v62, %v461_v1 }
 0x3a3   :  { %v463_v4 = vadd.f32 %v922_v62, %v462_v2 }
 0x3a4   :  { %v924_v3 = vpop.eup %923 }
 0x3a5   :  { %v475_v5 = vmul.f32 %v924_v3, %v456_v63  ;;  %v467_v10 = vsel %vm466_vm7, %v922_v62, %v463_v4  ;;  %vm480_vm8 = vweird.f32 %v924_v3 }
 0x3a6   :  { %v472_v15 = vsel %vm469_vm10, %v471_v13, %v467_v10  ;;  %vm481_vm12 = vmor %vm479_vm11, %vm480_vm8 }
 0x3a7   :  { %v476_v8 = vsub.f32 1.0, %v475_v5  ;;  %v519_v19 = vmul.f32 %v472_v15, %v434_v54 }
 0x3a9   :  { %v477_v11 = vmul.f32 %v924_v3, %v476_v8 }
 0x3ab   :  { %v478_v14 = vadd.f32 %v924_v3, %v477_v11 }
 0x3ad   :  { %v482_v17 = vsel %vm481_vm12, %v924_v3, %v478_v14 }
 0x3ae   :  { %v487_v18 = vsel %vm484_vm13, %v486_v16, %v482_v17 }
 0x3af   :  { %v520_v20 = vmul.f32 %v487_v18, %v436_v57 }
 0x3b1   :  { %v523_v22 = vpack.c.bf16 %v520_v20, %v519_v19 }
 0x3b3   :  { %854 = vmatmul.msk.bf16.vlgmr.msrb.gmra.mxu3 %vm256_vm9, %v523_v22 }
 0x3fb   :  { %v438_v23 = vpop.f32.mrf.mxu1 }
 0x3fc   :  { %v439_v24 = vadd.f32 %v1098_v21, %v438_v23 }
 0x3fe   :  { %v852_v25 = vmul.f32 -1.442695, %v439_v24 }
 0x400   :  { %925 = vpow2.f32 %v852_v25 }
 0x403   :  { %v440_v26 = vpop.f32.mrf.mxu1 }
 0x404   :  { %v441_v27 = vadd.f32 %v1098_v21, %v440_v26 }
 0x406   :  { %v926_v28 = vpop.eup %925  ;;  %v853_v30 = vmul.f32 -1.442695, %v441_v27 }
 0x407   :  { %v457_v31 = vadd.f32 1.0, %v926_v28 }
 0x408   :  { %927 = vpow2.f32 %v853_v30 }
 0x409   :  { %929 = vrcp.f32 %v457_v31  ;;  %v500_v41 = vand.u32 2147483648, %v457_v31  ;;  %vm494_vm15 = vweird.f32 %v457_v31  ;;  %v498_v42 = vand.u32 2147483647, %v457_v31 }
 0x40b   :  { %v501_v48 = vor.u32 1.1754944e-38, %v500_v41  ;;  %vm499_vm3 = vcmp.eq.f32.partialorder %v498_v42, 8.507059e+37 }
 0x40e   :  { %v928_v32 = vpop.eup %927 }
 0x40f   :  { %v930_v33 = vpop.eup %929  ;;  %v458_v34 = vadd.f32 1.0, %v928_v32 }
 0x410   :  { %v490_v35 = vmul.f32 %v930_v33, %v457_v31  ;;  %vm495_vm14 = vweird.f32 %v930_v33 }
 0x411   :  { %931 = vrcp.f32 %v458_v34  ;;  %vm496_vm1 = vmor %vm494_vm15, %vm495_vm14  ;;  %v515_v44 = vand.u32 2147483648, %v458_v34  ;;  %v513_v47 = vand.u32 2147483647, %v458_v34  ;;  %vm509_vm4 = vweird.f32 %v458_v34 }
 0x412   :  { %v491_v36 = vsub.f32 1.0, %v490_v35 }
 0x413   :  { %v516_v51 = vor.u32 1.1754944e-38, %v515_v44  ;;  %vm514_vm6 = vcmp.eq.f32.partialorder %v513_v47, 8.507059e+37 }
 0x414   :  { %v492_v37 = vmul.f32 %v930_v33, %v491_v36 }
 0x416   :  { %v493_v39 = vadd.f32 %v930_v33, %v492_v37 }
 0x417   :  { %v932_v38 = vpop.eup %931 }
 0x418   :  { %v505_v40 = vmul.f32 %v932_v38, %v458_v34  ;;  %v497_v45 = vsel %vm496_vm1, %v930_v33, %v493_v39  ;;  %vm510_vm2 = vweird.f32 %v932_v38 }
 0x419   :  { %v502_v50 = vsel %vm499_vm3, %v501_v48, %v497_v45  ;;  %vm511_vm5 = vmor %vm509_vm4, %vm510_vm2 }
 0x41a   :  { %v506_v43 = vsub.f32 1.0, %v505_v40  ;;  %v521_v54 = vmul.f32 %v502_v50, %v439_v24 }
 0x41c   :  { %v507_v46 = vmul.f32 %v932_v38, %v506_v43 }
 0x41e   :  { %v508_v49 = vadd.f32 %v932_v38, %v507_v46 }
 0x420   :  { %v512_v52 = vsel %vm511_vm5, %v932_v38, %v508_v49 }
 0x421   :  { %v517_v53 = vsel %vm514_vm6, %v516_v51, %v512_v52 }
 0x422   :  { %v522_v55 = vmul.f32 %v517_v53, %v441_v27 }
 0x424   :  { %v524_v56 = vpack.c.bf16 %v522_v55, %v521_v54 }
 0x426   :  { %855 = vmatmul.msk.bf16.gmra.mxu3 %vm256_vm9, %v524_v56 }
 0x436   :  { %v540_v57 = vpop.f32.mrf.mxu3 }
 0x437   :  { %v541_v59 = vadd.f32 %v1118_v29, %v540_v57 }
 0x43e   :  { %v542_v58 = vpop.f32.mrf.mxu3 }
 0x43f   :  { %v543_v60 = vadd.f32 %v1118_v29, %v542_v58 }
 0x441   :  { %v550_v61 = vpack.c.bf16 %v543_v60, %v541_v59 }
 0x443   :  { %856 = vmatmul.msk.bf16.vlgmr.msrb.gmra.mxu2 %vm57_vm0, %v550_v61 }
 0x4a9   :  { %v545_v62 = vpop.f32.mrf.mxu3 }
 0x4aa   :  { %v546_v0 = vadd.f32 %v1118_v29, %v545_v62 }
 0x4b1   :  { %v547_v63 = vpop.f32.mrf.mxu3 }
 0x4b2   :  { %v548_v1 = vadd.f32 %v1118_v29, %v547_v63 }
 0x4b4   :  { %v551_v2 = vpack.c.bf16 %v548_v1, %v546_v0 }
 0x4b6   :  { %857 = vmatmul.msk.bf16.gmra.mxu2 %vm57_vm0, %v551_v2 }
 0x4c6   :  { %v567_v3 = vpop.f32.mrf.mxu2 }
 0x4c7   :  { %v568_v4 = vadd.f32 %v1098_v21, %v567_v3 }
 0x4c9   :  { %v858_v5 = vmul.f32 -1.442695, %v568_v4 }
 0x4cb   :  { %933 = vpow2.f32 %v858_v5 }
 0x4ce   :  { %v569_v6 = vpop.f32.mrf.mxu2 }
 0x4cf   :  { %v570_v7 = vadd.f32 %v1098_v21, %v569_v6 }
 0x4d1   :  { %v934_v8 = vpop.eup %933  ;;  %v859_v9 = vmul.f32 -1.442695, %v570_v7 }
 0x4d2   :  { %v589_v10 = vadd.f32 1.0, %v934_v8 }
 0x4d3   :  { %935 = vpow2.f32 %v859_v9 }
 0x4d4   :  { %937 = vrcp.f32 %v589_v10  ;;  %v604_v20 = vand.u32 2147483648, %v589_v10  ;;  %vm598_vm8 = vweird.f32 %v589_v10  ;;  %v602_v22 = vand.u32 2147483647, %v589_v10 }
 0x4d6   :  { %v605_v28 = vor.u32 1.1754944e-38, %v604_v20  ;;  %vm603_vm12 = vcmp.eq.f32.partialorder %v602_v22, 8.507059e+37 }
 0x4d9   :  { %v936_v11 = vpop.eup %935 }
 0x4da   :  { %v938_v12 = vpop.eup %937  ;;  %v590_v13 = vadd.f32 1.0, %v936_v11 }
 0x4db   :  { %v594_v14 = vmul.f32 %v938_v12, %v589_v10  ;;  %vm599_vm7 = vweird.f32 %v938_v12 }
 0x4dc   :  { %939 = vrcp.f32 %v590_v13  ;;  %vm600_vm10 = vmor %vm598_vm8, %vm599_vm7  ;;  %v619_v24 = vand.u32 2147483648, %v590_v13  ;;  %v617_v27 = vand.u32 2147483647, %v590_v13  ;;  %vm613_vm13 = vweird.f32 %v590_v13 }
 0x4dd   :  { %v595_v15 = vsub.f32 1.0, %v594_v14 }
 0x4de   :  { %v620_v32 = vor.u32 1.1754944e-38, %v619_v24  ;;  %vm618_vm15 = vcmp.eq.f32.partialorder %v617_v27, 8.507059e+37 }
 0x4df   :  { %v596_v16 = vmul.f32 %v938_v12, %v595_v15 }
 0x4e1   :  { %v597_v18 = vadd.f32 %v938_v12, %v596_v16 }
 0x4e2   :  { %v940_v17 = vpop.eup %939 }
 0x4e3   :  { %v609_v19 = vmul.f32 %v940_v17, %v590_v13  ;;  %v601_v25 = vsel %vm600_vm10, %v938_v12, %v597_v18  ;;  %vm614_vm11 = vweird.f32 %v940_v17  ;;  %v1009_v13 = vmov 32.0   ;;  %v742_v18 = vpop.permute.xlu1 %741 }
 0x4e4   :  { %v606_v31 = vsel %vm603_vm12, %v605_v28, %v601_v25  ;;  %vm615_vm14 = vmor %vm613_vm13, %vm614_vm11 }
 0x4e5   :  { %v610_v23 = vsub.f32 1.0, %v609_v19  ;;  %v653_v35 = vmul.f32 %v606_v31, %v568_v4 }
 0x4e7   :  { %v611_v26 = vmul.f32 %v940_v17, %v610_v23 }
 0x4e9   :  { %v612_v30 = vadd.f32 %v940_v17, %v611_v26 }
 0x4eb   :  { %v616_v33 = vsel %vm615_vm14, %v940_v17, %v612_v30  ;;  %v744_v27 = vpop.permute.xlu1 %743 }
 0x4ec   :  { %v621_v34 = vsel %vm618_vm15, %v620_v32, %v616_v33 }
 0x4ed   :  { %v654_v36 = vmul.f32 %v621_v34, %v570_v7 }
 0x4ef   :  { %v657_v37 = vpack.c.bf16 %v654_v36, %v653_v35 }
 0x4f1   :  { %862 = vmatmul.msk.bf16.vlgmr.msra.gmra.mxu0 %vm256_vm9, %v657_v37 }
 0x539   :  { %v572_v38 = vpop.f32.mrf.mxu2 }
 0x53a   :  { %v573_v39 = vadd.f32 %v1098_v21, %v572_v38 }
 0x53c   :  { %v860_v40 = vmul.f32 -1.442695, %v573_v39 }
 0x53e   :  { %941 = vpow2.f32 %v860_v40 }
 0x541   :  { %v574_v41 = vpop.f32.mrf.mxu2 }
 0x542   :  { %v575_v42 = vadd.f32 %v1098_v21, %v574_v41 }
 0x544   :  { %v942_v43 = vpop.eup %941  ;;  %v861_v44 = vmul.f32 -1.442695, %v575_v42 }
 0x545   :  { %v591_v45 = vadd.f32 1.0, %v942_v43 }
 0x546   :  { %943 = vpow2.f32 %v861_v44 }
 0x547   :  { %945 = vrcp.f32 %v591_v45  ;;  %v634_v55 = vand.u32 2147483648, %v591_v45  ;;  %vm628_vm2 = vweird.f32 %v591_v45  ;;  %v632_v56 = vand.u32 2147483647, %v591_v45 }
 0x549   :  { %v635_v61 = vor.u32 1.1754944e-38, %v634_v55  ;;  %vm633_vm5 = vcmp.eq.f32.partialorder %v632_v56, 8.507059e+37 }
 0x54c   :  { %v944_v46 = vpop.eup %943 }
 0x54d   :  { %v946_v47 = vpop.eup %945  ;;  %v592_v48 = vadd.f32 1.0, %v944_v46 }
 0x54e   :  { %v624_v49 = vmul.f32 %v946_v47, %v591_v45  ;;  %vm629_vm1 = vweird.f32 %v946_v47 }
 0x54f   :  { %947 = vrcp.f32 %v592_v48  ;;  %vm630_vm3 = vmor %vm628_vm2, %vm629_vm1  ;;  %v649_v57 = vand.u32 2147483648, %v592_v48  ;;  %v647_v60 = vand.u32 2147483647, %v592_v48  ;;  %vm643_vm6 = vweird.f32 %v592_v48 }
 0x550   :  { %v625_v50 = vsub.f32 1.0, %v624_v49  ;;  %949 = vrcp.f32 %v1009_v13 }
 0x551   :  { %v650_v0 = vor.u32 1.1754944e-38, %v649_v57  ;;  %vm648_vm8 = vcmp.eq.f32.partialorder %v647_v60, 8.507059e+37 }
 0x552   :  { %v626_v51 = vmul.f32 %v946_v47, %v625_v50 }
 0x554   :  { %v627_v53 = vadd.f32 %v946_v47, %v626_v51 }
 0x555   :  { %v948_v52 = vpop.eup %947 }
 0x556   :  { %v639_v54 = vmul.f32 %v948_v52, %v592_v48  ;;  %v631_v58 = vsel %vm630_vm3, %v946_v47, %v627_v53  ;;  %vm644_vm4 = vweird.f32 %v948_v52  ;;  %v950_v15 = vpop.eup %949  ;;  %v884_v48 = vld [vmem:[%s1186_s7] ss:$0 sm:$0xff]  ;;  %s1010_s7 = smov [#allocation3]  }
 0x557   :  { %v636_v63 = vsel %vm633_vm5, %v635_v61, %v631_v58  ;;  %vm645_vm7 = vmor %vm643_vm6, %vm644_vm4  ;;  %v701_v17 = vmul.f32 32.0, %v950_v15  ;;  %s769_s11 = sshll.u32 %s1010_s7, 4  ;;  %s770_s11 = int_to_ptr.vmem [resolvable:$true] %s769_s11 }
 0x558   :  { %v640_v21 = vsub.f32 1.0, %v639_v54  ;;  %v655_v3 = vmul.f32 %v636_v63, %v573_v39 }
 0x559   :  { %v702_v20 = vsub.f32 1.0, %v701_v17 }
 0x55a   :  { %v641_v59 = vmul.f32 %v948_v52, %v640_v21 }
 0x55b   :  { %v703_v23 = vmul.f32 %v950_v15, %v702_v20 }
 0x55c   :  { %v642_v62 = vadd.f32 %v948_v52, %v641_v59 }
 0x55d   :  { %v704_v26 = vadd.f32 %v950_v15, %v703_v23 }
 0x55e   :  { %v646_v1 = vsel %vm645_vm7, %v948_v52, %v642_v62 }
 0x55f   :  { %v651_v2 = vsel %vm648_vm8, %v650_v0, %v646_v1 }
 0x560   :  { %v656_v4 = vmul.f32 %v651_v2, %v575_v42 }
 0x562   :  { %v658_v5 = vpack.c.bf16 %v656_v4, %v655_v3 }
 0x564   :  { %863 = vmatmul.msk.bf16.gmra.mxu0 %vm256_vm9, %v658_v5  ;;  %vm705_vm9 = vweird.f32 %v950_v15 }
 0x565   :  { %v706_v32 = vsel %vm705_vm9, %v950_v15, %v704_v26 }
 0x56e   :  { %v674_v6 = vpop.f32.mrf.mxu0 }
 0x56f   :  { %v675_v7 = vadd.f32 %v1118_v29, %v674_v6 }
 0x571   :  { %684 = vst.msk [vmem:[#allocation2] sm:$0xff] %vm57_vm0, %v675_v7 }
 0x576   :  { %v676_v8 = vpop.f32.mrf.mxu0 }
 0x577   :  { %v677_v9 = vadd.f32 %v1118_v29, %v676_v8 }
 0x578   :  { %v688_v39 = vld [vmem:[#allocation2] sm:$0xff] }
 0x579   :  { %685 = vst.msk [vmem:[#allocation2 + $0x8] sm:$0xff] %vm57_vm0, %v677_v9  ;;  %v692_v40 = vmul.f32 %v688_v39, %v688_v39 }
 0x57b   :  { %v694_v42 = vsel %vm57_vm0, %v692_v40, 0.0 }
 0x580   :  { %v689_v10 = vld [vmem:[#allocation2 + $0x8] sm:$0xff] }
 0x581   :  { %v693_v11 = vmul.f32 %v689_v10, %v689_v10 }
 0x583   :  { %v697_v12 = vsel %vm57_vm0, %v693_v11, 0.0 }
 0x584   :  { %698 = vadd.xlane.f32.xlu0 %v697_v12 }
 0x5e1   :  { %v679_v14 = vpop.f32.mrf.mxu0 }
 0x5e2   :  { %v680_v16 = vadd.f32 %v1118_v29, %v679_v14 }
 0x5e4   :  { %686 = vst.msk [vmem:[#allocation2 + $0x10] sm:$0xff] %vm57_vm0, %v680_v16 }
 0x5e9   :  { %v681_v19 = vpop.f32.mrf.mxu0 }
 0x5ea   :  { %v682_v22 = vadd.f32 %v1118_v29, %v681_v19 }
 0x5eb   :  { %v690_v24 = vld [vmem:[#allocation2 + $0x10] sm:$0xff] }
 0x5ec   :  { %687 = vst.msk [vmem:[#allocation2 + $0x18] sm:$0xff] %vm57_vm0, %v682_v22  ;;  %v747_v25 = vsub.f32 %v690_v24, %v742_v18 }
 0x5ee   :  { %v749_v31 = vmul.f32 %v747_v25, %v747_v25 }
 0x5f0   :  { %v751_v36 = vsel %vm57_vm0, %v749_v31, 0.0 }
 0x5f3   :  { %v691_v28 = vld [vmem:[#allocation2 + $0x18] sm:$0xff] }
 0x5f4   :  { %v748_v30 = vsub.f32 %v691_v28, %v744_v27 }
 0x5f6   :  { %v750_v33 = vmul.f32 %v748_v30, %v748_v30 }
 0x5f7   :  { %v699_v34 = vpop.xlane.xlu0 %698 }
 0x5f8   :  { %v708_v35 = vmul.f32 %v706_v32, %v699_v34  ;;  %v752_v37 = vsel %vm57_vm0, %v750_v33, 0.0 }
 0x5f9   :  { %v753_v29 = vadd.f32 %v752_v37, %v751_v36 }
 0x5fa   :  { %v710_v38 = vadd.f32 0.02, %v708_v35 }
 0x5fb   :  { %754 = vadd.xlane.f32.xlu2 %v753_v29 }
 0x5fc   :  { %951 = vrsqrt.f32 %v710_v38  ;;  %vm727_vm11 = vweird.f32 %v710_v38 }
 0x602   :  { %v952_v41 = vpop.eup %951 }
 0x603   :  { %v722_v43 = vmul.f32 %v952_v41, %v710_v38  ;;  %695 = vadd.xlane.f32.xlu2 %v694_v42  ;;  %vm728_vm10 = vweird.f32 %v952_v41 }
 0x604   :  { %vm729_vm12 = vmor %vm727_vm11, %vm728_vm10 }
 0x605   :  { %v723_v44 = vmul.f32 %v952_v41, %v722_v43 }
 0x607   :  { %v724_v45 = vmul.f32 0.5, %v723_v44 }
 0x609   :  { %v725_v46 = vsub.f32 1.5, %v724_v45 }
 0x60b   :  { %v726_v47 = vmul.f32 %v952_v41, %v725_v46 }
 0x60d   :  { %v730_v49 = vsel %vm729_vm12, %v952_v41, %v726_v47 }
 0x60e   :  { %v732_v50 = vmul.f32 %v730_v49, %v689_v10 }
 0x610   :  { %v738_v51 = vmul.f32 %v884_v48, %v732_v50 }
 0x612   :  { %740 = vst.msk [vmem:[#allocation3 + $0x8] sm:$0xff] %vm57_vm0, %v738_v51 }
 0x66e   :  { %v755_v52 = vpop.xlane.xlu2 %754 }
 0x66f   :  { %v756_v53 = vrot.slane %v755_v52, 4 }
 0x671   :  { %v757_v54 = vadd.f32 %v756_v53, %v755_v52 }
 0x673   :  { %v758_v55 = vrot.slane %v757_v54, 2 }
 0x675   :  { %v759_v56 = vadd.f32 %v758_v55, %v757_v54 }
 0x676   :  { %v696_v21 = vpop.xlane.xlu2 %695 }
 0x677   :  { %v707_v57 = vmul.f32 %v706_v32, %v696_v21  ;;  %v760_v58 = vrot.slane %v759_v56, 1 }
 0x679   :  { %v709_v59 = vadd.f32 0.02, %v707_v57  ;;  %v761_v60 = vadd.f32 %v760_v58, %v759_v56 }
 0x67b   :  { %953 = vrsqrt.f32 %v709_v59  ;;  %872 = vpush %v761_v60  ;;  %vm717_vm14 = vweird.f32 %v709_v59 }
 0x681   :  { %v954_v61 = vpop.eup %953 }
 0x682   :  { %v712_v62 = vmul.f32 %v954_v61, %v709_v59  ;;  %vm718_vm13 = vweird.f32 %v954_v61 }
 0x683   :  { %vm719_vm15 = vmor %vm717_vm14, %vm718_vm13 }
 0x684   :  { %v713_v63 = vmul.f32 %v954_v61, %v712_v62 }
 0x686   :  { %v714_v0 = vmul.f32 0.5, %v713_v63 }
 0x688   :  { %v715_v1 = vsub.f32 1.5, %v714_v0 }
 0x68a   :  { %v716_v2 = vmul.f32 %v954_v61, %v715_v1 }
 0x68c   :  { %v720_v3 = vsel %vm719_vm15, %v954_v61, %v716_v2 }
 0x68d   :  { %v731_v4 = vmul.f32 %v720_v3, %v688_v39 }
 0x68f   :  { %v737_v5 = vmul.f32 %v884_v48, %v731_v4 }
 0x691   :  { %739 = vst.msk [vmem:[#allocation3] sm:$0xff] %vm57_vm0, %v737_v5 }
 0x692   :  { %777 = dma.vmem_to_hbm [thread:$0]  %s770_s11, 256, %s772_s14, [#allocation4], %s1011_s15, %s1011_s15, %s1012_s16  }
 0x6ac   :  { %s873_s20 = spop %872 }
 0x6ad   :  { %v763_v6 = vstv %s873_s20 }
 0x6ae   :  { %764 = vst [vmem:[#allocation5] sm:$0x1] %v763_v6 }
 0x6af   :  { %788 = dma.vmem_to_hbm [thread:$0]  %s784_s18, 16, %s786_s0, [#allocation6]  }
 0x6b0   :  { %1003 = dma.done.wait [#allocation4], 256  }
 0x6b1   :  { %1004 = vsyncadd [#allocation4], 4294967040 }
 0x6b2   :  { %1005 = dma.done.wait [#allocation6], 16  }
 0x6b3   :  { %1006 = vsyncadd [#allocation6], 4294967280 }
 0x6b4   :  { %797 = vsyncpa [#allocation4], 1 }
 0x6b5   :  { %798 = vsyncpa [#allocation6], 1 }

// kernel: tpu_custom_call.1
= control target key start
LH: loop header
LB: loop body
LE: loop exit
PB: predicated region body
PF: predicated region fallthrough
CT: control target
= control target key end

     0   :  { %15 = vsyncpa [#allocation4], 0  ;;  %s1179_s0 = inlined_call_operand.vmem [shape: f32[16,32], index: 0, kind: input, shape index: {}]   ;;  %s1180_s1 = inlined_call_operand.vmem [shape: bf16[32,96], index: 1, kind: input, shape index: {}]   ;;  %s1181_s2 = inlined_call_operand.vmem [shape: f32[1,96], index: 2, kind: input, shape index: {}]   ;;  %s1182_s3 = inlined_call_operand.vmem [shape: bf16[32,64], index: 3, kind: input, shape index: {}]   ;;  %s1183_s4 = inlined_call_operand.vmem [shape: f32[1,64], index: 4, kind: input, shape index: {}]   ;;  %s1184_s5 = inlined_call_operand.vmem [shape: bf16[64,32], index: 5, kind: input, shape index: {}]   ;;  %s1185_s6 = inlined_call_operand.vmem [shape: f32[1,32], index: 6, kind: input, shape index: {}]   ;;  %s1186_s7 = inlined_call_operand.vmem [shape: f32[1,32], index: 7, kind: input, shape index: {}]   ;;  %s1187_s8 = inlined_call_operand.hbm [shape: f32[16,32], index: 8, kind: output, shape index: {0}]   ;;  %s1188_s9 = inlined_call_operand.hbm [shape: f32[1,1,128], index: 9, kind: output, shape index: {1}]  }
   0x1   :  { %v865_v0 = vld [vmem:[%s1180_s1 + $0x8] sm:$0xff]  ;;  %v864_v1 = vld [vmem:[%s1180_s1] sm:$0xff] }
   0x2   :  { %v34_v2 = vld [vmem:[%s1179_s0] sm:$0xff]  ;;  %v35_v3 = vld [vmem:[%s1179_s0 + $0x8] sm:$0xff]  ;;  %67 = vmatpush.bf16.msra.mxu0 %v865_v0 }
   0x3   :  { %16 = vsyncpa [#allocation6], 0  ;;  %v40_v4 = vpack.c.bf16 %v35_v3, %v34_v2  ;;  %vm57_vm0 = vcmask 261120   ;;  %v867_v5 = vld [vmem:[%s1182_s3 + $0x8] sm:$0xff]  ;;  %v866_v6 = vld [vmem:[%s1182_s3] sm:$0xff]  ;;  %s1007_s21 = smov 64  }
   0x4   :  { %134 = vmatpush.bf16.msra.mxu1 %v867_v5  ;;  %296 = vmatpush.bf16.msra.mxu3 %v867_v5  ;;  %v881_v7 = vld [vmem:[%s1181_s2] ss:$0 sm:$0xff]  ;;  %s1008_s22 = smov 96   ;;  %v871_v20 = vld [vmem:[%s1184_s5 + $0x18] sm:$0xff]  ;;  %v870_v22 = vld [vmem:[%s1184_s5 + $0x10] sm:$0xff]  ;;  %vm256_vm9 = vcmask 523264  }
   0x5   :  { %267 = vmatpush.bf16.msra.mxu2 %v871_v20  ;;  %v1098_v21 = vld [vmem:[%s1183_s4] ss:$0 sm:$0xff]  ;;  %v869_v25 = vld [vmem:[%s1184_s5 + $0x8] sm:$0xff]  ;;  %s771_s14 = sshll.u32 %s1187_s8, 4  ;;  %s1011_s15 = smov 128   ;;  %s772_s14 = int_to_ptr.hbm [resolvable:$true] %s771_s14 }
   0x6   :  { %68 = vmatpush.bf16.msra.mxu0 %v864_v1  ;;  %v868_v27 = vld [vmem:[%s1184_s5] sm:$0xff]  ;;  %s1012_s16 = smov 8   ;;  %s1013_s17 = smov [#allocation5]  }
   0x7   :  { %s783_s18 = sshll.u32 %s1013_s17, 4  ;;  %s785_s0 = sshll.u32 %s1188_s9, 4  ;;  %s784_s18 = int_to_ptr.vmem [resolvable:$true] %s783_s18  ;;  %s786_s0 = int_to_ptr.hbm [resolvable:$true] %s785_s0 }
   0x8   :  { %135 = vmatpush.bf16.msra.mxu1 %v866_v6  ;;  %297 = vmatpush.bf16.msra.mxu3 %v866_v6 }
   0x9   :  { %807 = vmatmul.msk.bf16.vlgmr.msra.gmra.mxu0 %vm57_vm0, %v40_v4  ;;  %268 = vmatpush.bf16.msra.mxu2 %v870_v22 }
   0xa   :  { %401 = vmatpush.bf16.msrb.mxu0 %v871_v20 }
   0xc   :  { %430 = vmatpush.bf16.msrb.mxu1 %v867_v5  ;;  %535 = vmatpush.bf16.msrb.mxu3 %v871_v20 }
   0xd   :  { %269 = vmatpush.bf16.msra.mxu2 %v869_v25 }
   0xe   :  { %402 = vmatpush.bf16.msrb.mxu0 %v870_v22 }
  0x10   :  { %431 = vmatpush.bf16.msrb.mxu1 %v866_v6  ;;  %536 = vmatpush.bf16.msrb.mxu3 %v870_v22 }
  0x11   :  { %270 = vmatpush.bf16.msra.mxu2 %v868_v27 }
  0x12   :  { %403 = vmatpush.bf16.msrb.mxu0 %v869_v25 }
  0x14   :  { %537 = vmatpush.bf16.msrb.mxu3 %v869_v25 }
  0x15   :  { %564 = vmatpush.bf16.msrb.mxu2 %v867_v5 }
  0x16   :  { %404 = vmatpush.bf16.msrb.mxu0 %v868_v27 }
  0x18   :  { %538 = vmatpush.bf16.msrb.mxu3 %v868_v27 }
  0x19   :  { %565 = vmatpush.bf16.msrb.mxu2 %v866_v6 }
  0x1a   :  { %669 = vmatpush.bf16.msra.mxu0 %v871_v20 }
  0x1e   :  { %670 = vmatpush.bf16.msra.mxu0 %v870_v22 }
  0x22   :  { %671 = vmatpush.bf16.msra.mxu0 %v869_v25 }
  0x26   :  { %672 = vmatpush.bf16.msra.mxu0 %v868_v27 }
  0x86   :  { %v70_v8 = vpop.f32.mrf.mxu0 }
  0x87   :  { %v71_v9 = vadd.f32 %v881_v7, %v70_v8 }
  0x89   :  { %75 = vst.msk [vmem:[#allocation2] sm:$0xff] %vm57_vm0, %v71_v9  ;;  %741 = vrot.lane.b32.xlu1 %v71_v9, %s1007_s21  ;;  %79 = vrot.lane.b32.xlu0 %v71_v9, %s1008_s22 }
  0x8e   :  { %v72_v10 = vpop.f32.mrf.mxu0 }
  0x8f   :  { %v73_v11 = vadd.f32 %v881_v7, %v72_v10 }
  0x90   :  { %v101_v12 = vld [vmem:[#allocation2] sm:$0xff] }
  0x91   :  { %76 = vst.msk [vmem:[#allocation2 + $0x8] sm:$0xff] %vm57_vm0, %v73_v11  ;;  %743 = vrot.lane.b32.xlu1 %v73_v11, %s1007_s21  ;;  %81 = vrot.lane.b32.xlu0 %v73_v11, %s1008_s22 }
  0x98   :  { %v102_v13 = vld [vmem:[#allocation2 + $0x8] sm:$0xff] }
  0x99   :  { %v105_v14 = vpack.c.bf16 %v102_v13, %v101_v12 }
  0x9b   :  { %816 = vmatmul.msk.bf16.vlgmr.msra.gmra.mxu1 %vm57_vm0, %v105_v14 }
  0xfb   :  { %v80_v15 = vpop.permute.xlu0 %79 }
  0xfc   :  { %85 = vst.msk [vmem:[#allocation2 + $0x10] sm:$0xff] %vm57_vm0, %v80_v15 }
 0x103   :  { %v82_v16 = vpop.permute.xlu0 %81  ;;  %v103_v17 = vld [vmem:[#allocation2 + $0x10] sm:$0xff] }
 0x104   :  { %86 = vst.msk [vmem:[#allocation2 + $0x18] sm:$0xff] %vm57_vm0, %v82_v16 }
 0x10b   :  { %v104_v18 = vld [vmem:[#allocation2 + $0x18] sm:$0xff] }
 0x10c   :  { %v106_v19 = vpack.c.bf16 %v104_v18, %v103_v17 }
 0x10e   :  { %817 = vmatmul.msk.bf16.gmra.mxu1 %vm57_vm0, %v106_v19 }
 0x118   :  { %v137_v23 = vpop.f32.mrf.mxu1 }
 0x119   :  { %v138_v24 = vadd.f32 %v1098_v21, %v137_v23 }
 0x11b   :  { %v818_v26 = vmul.f32 -1.442695, %v138_v24 }
 0x11d   :  { %885 = vpow2.f32 %v818_v26 }
 0x120   :  { %v139_v28 = vpop.f32.mrf.mxu1 }
 0x121   :  { %v140_v29 = vadd.f32 %v1098_v21, %v139_v28 }
 0x123   :  { %v886_v30 = vpop.eup %885  ;;  %v819_v31 = vmul.f32 -1.442695, %v140_v29 }
 0x124   :  { %v159_v32 = vadd.f32 1.0, %v886_v30 }
 0x125   :  { %887 = vpow2.f32 %v819_v31 }
 0x126   :  { %889 = vrcp.f32 %v159_v32  ;;  %v174_v42 = vand.u32 2147483648, %v159_v32  ;;  %vm168_vm2 = vweird.f32 %v159_v32  ;;  %v172_v43 = vand.u32 2147483647, %v159_v32 }
 0x128   :  { %v175_v49 = vor.u32 1.1754944e-38, %v174_v42  ;;  %vm173_vm5 = vcmp.eq.f32.partialorder %v172_v43, 8.507059e+37 }
 0x12b   :  { %v888_v33 = vpop.eup %887 }
 0x12c   :  { %v890_v34 = vpop.eup %889  ;;  %v160_v35 = vadd.f32 1.0, %v888_v33 }
 0x12d   :  { %v164_v36 = vmul.f32 %v890_v34, %v159_v32  ;;  %vm169_vm1 = vweird.f32 %v890_v34 }
 0x12e   :  { %891 = vrcp.f32 %v160_v35  ;;  %vm170_vm3 = vmor %vm168_vm2, %vm169_vm1  ;;  %v189_v45 = vand.u32 2147483648, %v160_v35  ;;  %v187_v48 = vand.u32 2147483647, %v160_v35  ;;  %vm183_vm6 = vweird.f32 %v160_v35 }
 0x12f   :  { %v165_v37 = vsub.f32 1.0, %v164_v36 }
 0x130   :  { %v190_v52 = vor.u32 1.1754944e-38, %v189_v45  ;;  %vm188_vm8 = vcmp.eq.f32.partialorder %v187_v48, 8.507059e+37 }
 0x131   :  { %v166_v38 = vmul.f32 %v890_v34, %v165_v37 }
 0x133   :  { %v167_v40 = vadd.f32 %v890_v34, %v166_v38 }
 0x134   :  { %v892_v39 = vpop.eup %891 }
 0x135   :  { %v179_v41 = vmul.f32 %v892_v39, %v160_v35  ;;  %v171_v46 = vsel %vm170_vm3, %v890_v34, %v167_v40  ;;  %vm184_vm4 = vweird.f32 %v892_v39 }
 0x136   :  { %v176_v51 = vsel %vm173_vm5, %v175_v49, %v171_v46  ;;  %vm185_vm7 = vmor %vm183_vm6, %vm184_vm4 }
 0x137   :  { %v180_v44 = vsub.f32 1.0, %v179_v41  ;;  %v223_v55 = vmul.f32 %v176_v51, %v138_v24 }
 0x139   :  { %v181_v47 = vmul.f32 %v892_v39, %v180_v44 }
 0x13b   :  { %v182_v50 = vadd.f32 %v892_v39, %v181_v47 }
 0x13d   :  { %v186_v53 = vsel %vm185_vm7, %v892_v39, %v182_v50 }
 0x13e   :  { %v191_v54 = vsel %vm188_vm8, %v190_v52, %v186_v53 }
 0x13f   :  { %v224_v56 = vmul.f32 %v191_v54, %v140_v29  ;;  %v1118_v29 = vld [vmem:[%s1185_s6] ss:$0 sm:$0xff] }
 0x141   :  { %v227_v57 = vpack.c.bf16 %v224_v56, %v223_v55 }
 0x143   :  { %838 = vmatmul.msk.bf16.vlgmr.msra.gmra.mxu2 %vm256_vm9, %v227_v57 }
 0x18b   :  { %v142_v58 = vpop.f32.mrf.mxu1 }
 0x18c   :  { %v143_v59 = vadd.f32 %v1098_v21, %v142_v58 }
 0x18e   :  { %v820_v60 = vmul.f32 -1.442695, %v143_v59 }
 0x190   :  { %893 = vpow2.f32 %v820_v60 }
 0x193   :  { %v144_v61 = vpop.f32.mrf.mxu1 }
 0x194   :  { %v145_v62 = vadd.f32 %v1098_v21, %v144_v61 }
 0x196   :  { %v894_v63 = vpop.eup %893  ;;  %v821_v0 = vmul.f32 -1.442695, %v145_v62 }
 0x197   :  { %v161_v1 = vadd.f32 1.0, %v894_v63 }
 0x198   :  { %895 = vpow2.f32 %v821_v0 }
 0x199   :  { %897 = vrcp.f32 %v161_v1  ;;  %v204_v11 = vand.u32 2147483648, %v161_v1  ;;  %vm198_vm11 = vweird.f32 %v161_v1  ;;  %v202_v12 = vand.u32 2147483647, %v161_v1 }
 0x19b   :  { %v205_v18 = vor.u32 1.1754944e-38, %v204_v11  ;;  %vm203_vm14 = vcmp.eq.f32.partialorder %v202_v12, 8.507059e+37 }
 0x19e   :  { %v896_v2 = vpop.eup %895 }
 0x19f   :  { %v898_v3 = vpop.eup %897  ;;  %v162_v4 = vadd.f32 1.0, %v896_v2 }
 0x1a0   :  { %v194_v5 = vmul.f32 %v898_v3, %v161_v1  ;;  %vm199_vm10 = vweird.f32 %v898_v3 }
 0x1a1   :  { %899 = vrcp.f32 %v162_v4  ;;  %vm200_vm12 = vmor %vm198_vm11, %vm199_vm10  ;;  %v219_v14 = vand.u32 2147483648, %v162_v4  ;;  %v217_v17 = vand.u32 2147483647, %v162_v4  ;;  %vm213_vm15 = vweird.f32 %v162_v4 }
 0x1a2   :  { %v195_v6 = vsub.f32 1.0, %v194_v5 }
 0x1a3   :  { %v220_v22 = vor.u32 1.1754944e-38, %v219_v14  ;;  %vm218_vm2 = vcmp.eq.f32.partialorder %v217_v17, 8.507059e+37 }
 0x1a4   :  { %v196_v7 = vmul.f32 %v898_v3, %v195_v6 }
 0x1a6   :  { %v197_v9 = vadd.f32 %v898_v3, %v196_v7 }
 0x1a7   :  { %v900_v8 = vpop.eup %899 }
 0x1a8   :  { %v209_v10 = vmul.f32 %v900_v8, %v162_v4  ;;  %v201_v15 = vsel %vm200_vm12, %v898_v3, %v197_v9  ;;  %vm214_vm13 = vweird.f32 %v900_v8 }
 0x1a9   :  { %v206_v20 = vsel %vm203_vm14, %v205_v18, %v201_v15  ;;  %vm215_vm1 = vmor %vm213_vm15, %vm214_vm13 }
 0x1aa   :  { %v210_v13 = vsub.f32 1.0, %v209_v10  ;;  %v225_v25 = vmul.f32 %v206_v20, %v143_v59 }
 0x1ac   :  { %v211_v16 = vmul.f32 %v900_v8, %v210_v13 }
 0x1ae   :  { %v212_v19 = vadd.f32 %v900_v8, %v211_v16 }
 0x1b0   :  { %v216_v23 = vsel %vm215_vm1, %v900_v8, %v212_v19 }
 0x1b1   :  { %v221_v24 = vsel %vm218_vm2, %v220_v22, %v216_v23 }
 0x1b2   :  { %v226_v26 = vmul.f32 %v221_v24, %v145_v62 }
 0x1b4   :  { %v228_v27 = vpack.c.bf16 %v226_v26, %v225_v25 }
 0x1b6   :  { %839 = vmatmul.msk.bf16.gmra.mxu2 %vm256_vm9, %v228_v27 }
 0x1c6   :  { %v272_v28 = vpop.f32.mrf.mxu2 }
 0x1c7   :  { %v273_v31 = vadd.f32 %v1118_v29, %v272_v28 }
 0x1ce   :  { %v274_v30 = vpop.f32.mrf.mxu2 }
 0x1cf   :  { %v275_v32 = vadd.f32 %v1118_v29, %v274_v30 }
 0x1d1   :  { %v282_v33 = vpack.c.bf16 %v275_v32, %v273_v31 }
 0x1d3   :  { %840 = vmatmul.msk.bf16.vlgmr.msra.gmra.mxu3 %vm57_vm0, %v282_v33 }
 0x239   :  { %v277_v34 = vpop.f32.mrf.mxu2 }
 0x23a   :  { %v278_v36 = vadd.f32 %v1118_v29, %v277_v34 }
 0x241   :  { %v279_v35 = vpop.f32.mrf.mxu2 }
 0x242   :  { %v280_v37 = vadd.f32 %v1118_v29, %v279_v35 }
 0x244   :  { %v283_v38 = vpack.c.bf16 %v280_v37, %v278_v36 }
 0x246   :  { %841 = vmatmul.msk.bf16.gmra.mxu3 %vm57_vm0, %v283_v38 }
 0x256   :  { %v299_v39 = vpop.f32.mrf.mxu3 }
 0x257   :  { %v300_v40 = vadd.f32 %v1098_v21, %v299_v39 }
 0x259   :  { %v842_v41 = vmul.f32 -1.442695, %v300_v40 }
 0x25b   :  { %901 = vpow2.f32 %v842_v41 }
 0x25e   :  { %v301_v42 = vpop.f32.mrf.mxu3 }
 0x25f   :  { %v302_v43 = vadd.f32 %v1098_v21, %v301_v42 }
 0x261   :  { %v902_v44 = vpop.eup %901  ;;  %v843_v45 = vmul.f32 -1.442695, %v302_v43 }
 0x262   :  { %v321_v46 = vadd.f32 1.0, %v902_v44 }
 0x263   :  { %903 = vpow2.f32 %v843_v45 }
 0x264   :  { %905 = vrcp.f32 %v321_v46  ;;  %v336_v56 = vand.u32 2147483648, %v321_v46  ;;  %vm330_vm4 = vweird.f32 %v321_v46  ;;  %v334_v57 = vand.u32 2147483647, %v321_v46 }
 0x266   :  { %v337_v63 = vor.u32 1.1754944e-38, %v336_v56  ;;  %vm335_vm7 = vcmp.eq.f32.partialorder %v334_v57, 8.507059e+37 }
 0x269   :  { %v904_v47 = vpop.eup %903 }
 0x26a   :  { %v906_v48 = vpop.eup %905  ;;  %v322_v49 = vadd.f32 1.0, %v904_v47 }
 0x26b   :  { %v326_v50 = vmul.f32 %v906_v48, %v321_v46  ;;  %vm331_vm3 = vweird.f32 %v906_v48 }
 0x26c   :  { %907 = vrcp.f32 %v322_v49  ;;  %vm332_vm5 = vmor %vm330_vm4, %vm331_vm3  ;;  %v351_v59 = vand.u32 2147483648, %v322_v49  ;;  %v349_v62 = vand.u32 2147483647, %v322_v49  ;;  %vm345_vm8 = vweird.f32 %v322_v49 }
 0x26d   :  { %v327_v51 = vsub.f32 1.0, %v326_v50 }
 0x26e   :  { %v352_v2 = vor.u32 1.1754944e-38, %v351_v59  ;;  %vm350_vm11 = vcmp.eq.f32.partialorder %v349_v62, 8.507059e+37 }
 0x26f   :  { %v328_v52 = vmul.f32 %v906_v48, %v327_v51 }
 0x271   :  { %v329_v54 = vadd.f32 %v906_v48, %v328_v52 }
 0x272   :  { %v908_v53 = vpop.eup %907 }
 0x273   :  { %v341_v55 = vmul.f32 %v908_v53, %v322_v49  ;;  %v333_v60 = vsel %vm332_vm5, %v906_v48, %v329_v54  ;;  %vm346_vm6 = vweird.f32 %v908_v53 }
 0x274   :  { %v338_v1 = vsel %vm335_vm7, %v337_v63, %v333_v60  ;;  %vm347_vm10 = vmor %vm345_vm8, %vm346_vm6 }
 0x275   :  { %v342_v58 = vsub.f32 1.0, %v341_v55  ;;  %v385_v5 = vmul.f32 %v338_v1, %v300_v40 }
 0x277   :  { %v343_v61 = vmul.f32 %v908_v53, %v342_v58 }
 0x279   :  { %v344_v0 = vadd.f32 %v908_v53, %v343_v61 }
 0x27b   :  { %v348_v3 = vsel %vm347_vm10, %v908_v53, %v344_v0 }
 0x27c   :  { %v353_v4 = vsel %vm350_vm11, %v352_v2, %v348_v3 }
 0x27d   :  { %v386_v6 = vmul.f32 %v353_v4, %v302_v43 }
 0x27f   :  { %v389_v7 = vpack.c.bf16 %v386_v6, %v385_v5 }
 0x281   :  { %846 = vmatmul.msk.bf16.vlgmr.msrb.gmra.mxu0 %vm256_vm9, %v389_v7 }
 0x2c9   :  { %v304_v8 = vpop.f32.mrf.mxu3 }
 0x2ca   :  { %v305_v9 = vadd.f32 %v1098_v21, %v304_v8 }
 0x2cc   :  { %v844_v10 = vmul.f32 -1.442695, %v305_v9 }
 0x2ce   :  { %909 = vpow2.f32 %v844_v10 }
 0x2d1   :  { %v306_v11 = vpop.f32.mrf.mxu3 }
 0x2d2   :  { %v307_v12 = vadd.f32 %v1098_v21, %v306_v11 }
 0x2d4   :  { %v910_v13 = vpop.eup %909  ;;  %v845_v14 = vmul.f32 -1.442695, %v307_v12 }
 0x2d5   :  { %v323_v15 = vadd.f32 1.0, %v910_v13 }
 0x2d6   :  { %911 = vpow2.f32 %v845_v14 }
 0x2d7   :  { %913 = vrcp.f32 %v323_v15  ;;  %v366_v26 = vand.u32 2147483648, %v323_v15  ;;  %vm360_vm13 = vweird.f32 %v323_v15  ;;  %v364_v27 = vand.u32 2147483647, %v323_v15 }
 0x2d9   :  { %v367_v34 = vor.u32 1.1754944e-38, %v366_v26  ;;  %vm365_vm1 = vcmp.eq.f32.partialorder %v364_v27, 8.507059e+37 }
 0x2dc   :  { %v912_v16 = vpop.eup %911 }
 0x2dd   :  { %v914_v17 = vpop.eup %913  ;;  %v324_v18 = vadd.f32 1.0, %v912_v16 }
 0x2de   :  { %v356_v19 = vmul.f32 %v914_v17, %v323_v15  ;;  %vm361_vm12 = vweird.f32 %v914_v17 }
 0x2df   :  { %915 = vrcp.f32 %v324_v18  ;;  %vm362_vm14 = vmor %vm360_vm13, %vm361_vm12  ;;  %v381_v30 = vand.u32 2147483648, %v324_v18  ;;  %v379_v33 = vand.u32 2147483647, %v324_v18  ;;  %vm375_vm2 = vweird.f32 %v324_v18 }
 0x2e0   :  { %v357_v20 = vsub.f32 1.0, %v356_v19 }
 0x2e1   :  { %v382_v37 = vor.u32 1.1754944e-38, %v381_v30  ;;  %vm380_vm4 = vcmp.eq.f32.partialorder %v379_v33, 8.507059e+37 }
 0x2e2   :  { %v358_v22 = vmul.f32 %v914_v17, %v357_v20 }
 0x2e4   :  { %v359_v24 = vadd.f32 %v914_v17, %v358_v22 }
 0x2e5   :  { %v916_v23 = vpop.eup %915 }
 0x2e6   :  { %v371_v25 = vmul.f32 %v916_v23, %v324_v18  ;;  %v363_v31 = vsel %vm362_vm14, %v914_v17, %v359_v24  ;;  %vm376_vm15 = vweird.f32 %v916_v23 }
 0x2e7   :  { %v368_v36 = vsel %vm365_vm1, %v367_v34, %v363_v31  ;;  %vm377_vm3 = vmor %vm375_vm2, %vm376_vm15 }
 0x2e8   :  { %v372_v28 = vsub.f32 1.0, %v371_v25  ;;  %v387_v40 = vmul.f32 %v368_v36, %v305_v9 }
 0x2ea   :  { %v373_v32 = vmul.f32 %v916_v23, %v372_v28 }
 0x2ec   :  { %v374_v35 = vadd.f32 %v916_v23, %v373_v32 }
 0x2ee   :  { %v378_v38 = vsel %vm377_vm3, %v916_v23, %v374_v35 }
 0x2ef   :  { %v383_v39 = vsel %vm380_vm4, %v382_v37, %v378_v38 }
 0x2f0   :  { %v388_v41 = vmul.f32 %v383_v39, %v307_v12 }
 0x2f2   :  { %v390_v42 = vpack.c.bf16 %v388_v41, %v387_v40 }
 0x2f4   :  { %847 = vmatmul.msk.bf16.gmra.mxu0 %vm256_vm9, %v390_v42 }
 0x2fe   :  { %v406_v43 = vpop.f32.mrf.mxu0 }
 0x2ff   :  { %v407_v45 = vadd.f32 %v1118_v29, %v406_v43 }
 0x306   :  { %v408_v44 = vpop.f32.mrf.mxu0 }
 0x307   :  { %v409_v46 = vadd.f32 %v1118_v29, %v408_v44 }
 0x309   :  { %v416_v47 = vpack.c.bf16 %v409_v46, %v407_v45 }
 0x30b   :  { %848 = vmatmul.msk.bf16.vlgmr.msrb.gmra.mxu1 %vm57_vm0, %v416_v47 }
 0x371   :  { %v411_v48 = vpop.f32.mrf.mxu0 }
 0x372   :  { %v412_v50 = vadd.f32 %v1118_v29, %v411_v48 }
 0x379   :  { %v413_v49 = vpop.f32.mrf.mxu0 }
 0x37a   :  { %v414_v51 = vadd.f32 %v1118_v29, %v413_v49 }
 0x37c   :  { %v417_v52 = vpack.c.bf16 %v414_v51, %v412_v50 }
 0x37e   :  { %849 = vmatmul.msk.bf16.gmra.mxu1 %vm57_vm0, %v417_v52 }
 0x388   :  { %v433_v53 = vpop.f32.mrf.mxu1 }
 0x389   :  { %v434_v54 = vadd.f32 %v1098_v21, %v433_v53 }
 0x38b   :  { %v850_v55 = vmul.f32 -1.442695, %v434_v54 }
 0x38d   :  { %917 = vpow2.f32 %v850_v55 }
 0x390   :  { %v435_v56 = vpop.f32.mrf.mxu1 }
 0x391   :  { %v436_v57 = vadd.f32 %v1098_v21, %v435_v56 }
 0x393   :  { %v918_v58 = vpop.eup %917  ;;  %v851_v59 = vmul.f32 -1.442695, %v436_v57 }
 0x394   :  { %v455_v60 = vadd.f32 1.0, %v918_v58 }
 0x395   :  { %919 = vpow2.f32 %v851_v59 }
 0x396   :  { %921 = vrcp.f32 %v455_v60  ;;  %v470_v6 = vand.u32 2147483648, %v455_v60  ;;  %vm464_vm6 = vweird.f32 %v455_v60  ;;  %v468_v7 = vand.u32 2147483647, %v455_v60 }
 0x398   :  { %v471_v13 = vor.u32 1.1754944e-38, %v470_v6  ;;  %vm469_vm10 = vcmp.eq.f32.partialorder %v468_v7, 8.507059e+37 }
 0x39b   :  { %v920_v61 = vpop.eup %919 }
 0x39c   :  { %v922_v62 = vpop.eup %921  ;;  %v456_v63 = vadd.f32 1.0, %v920_v61 }
 0x39d   :  { %v460_v0 = vmul.f32 %v922_v62, %v455_v60  ;;  %vm465_vm5 = vweird.f32 %v922_v62 }
 0x39e   :  { %923 = vrcp.f32 %v456_v63  ;;  %vm466_vm7 = vmor %vm464_vm6, %vm465_vm5  ;;  %v485_v9 = vand.u32 2147483648, %v456_v63  ;;  %v483_v12 = vand.u32 2147483647, %v456_v63  ;;  %vm479_vm11 = vweird.f32 %v456_v63 }
 0x39f   :  { %v461_v1 = vsub.f32 1.0, %v460_v0 }
 0x3a0   :  { %v486_v16 = vor.u32 1.1754944e-38, %v485_v9  ;;  %vm484_vm13 = vcmp.eq.f32.partialorder %v483_v12, 8.507059e+37 }
 0x3a1   :  { %v462_v2 = vmul.f32 %v922_v62, %v461_v1 }
 0x3a3   :  { %v463_v4 = vadd.f32 %v922_v62, %v462_v2 }
 0x3a4   :  { %v924_v3 = vpop.eup %923 }
 0x3a5   :  { %v475_v5 = vmul.f32 %v924_v3, %v456_v63  ;;  %v467_v10 = vsel %vm466_vm7, %v922_v62, %v463_v4  ;;  %vm480_vm8 = vweird.f32 %v924_v3 }
 0x3a6   :  { %v472_v15 = vsel %vm469_vm10, %v471_v13, %v467_v10  ;;  %vm481_vm12 = vmor %vm479_vm11, %vm480_vm8 }
 0x3a7   :  { %v476_v8 = vsub.f32 1.0, %v475_v5  ;;  %v519_v19 = vmul.f32 %v472_v15, %v434_v54 }
 0x3a9   :  { %v477_v11 = vmul.f32 %v924_v3, %v476_v8 }
 0x3ab   :  { %v478_v14 = vadd.f32 %v924_v3, %v477_v11 }
 0x3ad   :  { %v482_v17 = vsel %vm481_vm12, %v924_v3, %v478_v14 }
 0x3ae   :  { %v487_v18 = vsel %vm484_vm13, %v486_v16, %v482_v17 }
 0x3af   :  { %v520_v20 = vmul.f32 %v487_v18, %v436_v57 }
 0x3b1   :  { %v523_v22 = vpack.c.bf16 %v520_v20, %v519_v19 }
 0x3b3   :  { %854 = vmatmul.msk.bf16.vlgmr.msrb.gmra.mxu3 %vm256_vm9, %v523_v22 }
 0x3fb   :  { %v438_v23 = vpop.f32.mrf.mxu1 }
 0x3fc   :  { %v439_v24 = vadd.f32 %v1098_v21, %v438_v23 }
 0x3fe   :  { %v852_v25 = vmul.f32 -1.442695, %v439_v24 }
 0x400   :  { %925 = vpow2.f32 %v852_v25 }
 0x403   :  { %v440_v26 = vpop.f32.mrf.mxu1 }
 0x404   :  { %v441_v27 = vadd.f32 %v1098_v21, %v440_v26 }
 0x406   :  { %v926_v28 = vpop.eup %925  ;;  %v853_v30 = vmul.f32 -1.442695, %v441_v27 }
 0x407   :  { %v457_v31 = vadd.f32 1.0, %v926_v28 }
 0x408   :  { %927 = vpow2.f32 %v853_v30 }
 0x409   :  { %929 = vrcp.f32 %v457_v31  ;;  %v500_v41 = vand.u32 2147483648, %v457_v31  ;;  %vm494_vm15 = vweird.f32 %v457_v31  ;;  %v498_v42 = vand.u32 2147483647, %v457_v31 }
 0x40b   :  { %v501_v48 = vor.u32 1.1754944e-38, %v500_v41  ;;  %vm499_vm3 = vcmp.eq.f32.partialorder %v498_v42, 8.507059e+37 }
 0x40e   :  { %v928_v32 = vpop.eup %927 }
 0x40f   :  { %v930_v33 = vpop.eup %929  ;;  %v458_v34 = vadd.f32 1.0, %v928_v32 }
 0x410   :  { %v490_v35 = vmul.f32 %v930_v33, %v457_v31  ;;  %vm495_vm14 = vweird.f32 %v930_v33 }
 0x411   :  { %931 = vrcp.f32 %v458_v34  ;;  %vm496_vm1 = vmor %vm494_vm15, %vm495_vm14  ;;  %v515_v44 = vand.u32 2147483648, %v458_v34  ;;  %v513_v47 = vand.u32 2147483647, %v458_v34  ;;  %vm509_vm4 = vweird.f32 %v458_v34 }
 0x412   :  { %v491_v36 = vsub.f32 1.0, %v490_v35 }
 0x413   :  { %v516_v51 = vor.u32 1.1754944e-38, %v515_v44  ;;  %vm514_vm6 = vcmp.eq.f32.partialorder %v513_v47, 8.507059e+37 }
 0x414   :  { %v492_v37 = vmul.f32 %v930_v33, %v491_v36 }
 0x416   :  { %v493_v39 = vadd.f32 %v930_v33, %v492_v37 }
 0x417   :  { %v932_v38 = vpop.eup %931 }
 0x418   :  { %v505_v40 = vmul.f32 %v932_v38, %v458_v34  ;;  %v497_v45 = vsel %vm496_vm1, %v930_v33, %v493_v39  ;;  %vm510_vm2 = vweird.f32 %v932_v38 }
 0x419   :  { %v502_v50 = vsel %vm499_vm3, %v501_v48, %v497_v45  ;;  %vm511_vm5 = vmor %vm509_vm4, %vm510_vm2 }
 0x41a   :  { %v506_v43 = vsub.f32 1.0, %v505_v40  ;;  %v521_v54 = vmul.f32 %v502_v50, %v439_v24 }
 0x41c   :  { %v507_v46 = vmul.f32 %v932_v38, %v506_v43 }
 0x41e   :  { %v508_v49 = vadd.f32 %v932_v38, %v507_v46 }
 0x420   :  { %v512_v52 = vsel %vm511_vm5, %v932_v38, %v508_v49 }
 0x421   :  { %v517_v53 = vsel %vm514_vm6, %v516_v51, %v512_v52 }
 0x422   :  { %v522_v55 = vmul.f32 %v517_v53, %v441_v27 }
 0x424   :  { %v524_v56 = vpack.c.bf16 %v522_v55, %v521_v54 }
 0x426   :  { %855 = vmatmul.msk.bf16.gmra.mxu3 %vm256_vm9, %v524_v56 }
 0x436   :  { %v540_v57 = vpop.f32.mrf.mxu3 }
 0x437   :  { %v541_v59 = vadd.f32 %v1118_v29, %v540_v57 }
 0x43e   :  { %v542_v58 = vpop.f32.mrf.mxu3 }
 0x43f   :  { %v543_v60 = vadd.f32 %v1118_v29, %v542_v58 }
 0x441   :  { %v550_v61 = vpack.c.bf16 %v543_v60, %v541_v59 }
 0x443   :  { %856 = vmatmul.msk.bf16.vlgmr.msrb.gmra.mxu2 %vm57_vm0, %v550_v61 }
 0x4a9   :  { %v545_v62 = vpop.f32.mrf.mxu3 }
 0x4aa   :  { %v546_v0 = vadd.f32 %v1118_v29, %v545_v62 }
 0x4b1   :  { %v547_v63 = vpop.f32.mrf.mxu3 }
 0x4b2   :  { %v548_v1 = vadd.f32 %v1118_v29, %v547_v63 }
 0x4b4   :  { %v551_v2 = vpack.c.bf16 %v548_v1, %v546_v0 }
 0x4b6   :  { %857 = vmatmul.msk.bf16.gmra.mxu2 %vm57_vm0, %v551_v2 }
 0x4c6   :  { %v567_v3 = vpop.f32.mrf.mxu2 }
 0x4c7   :  { %v568_v4 = vadd.f32 %v1098_v21, %v567_v3 }
 0x4c9   :  { %v858_v5 = vmul.f32 -1.442695, %v568_v4 }
 0x4cb   :  { %933 = vpow2.f32 %v858_v5 }
 0x4ce   :  { %v569_v6 = vpop.f32.mrf.mxu2 }
 0x4cf   :  { %v570_v7 = vadd.f32 %v1098_v21, %v569_v6 }
 0x4d1   :  { %v934_v8 = vpop.eup %933  ;;  %v859_v9 = vmul.f32 -1.442695, %v570_v7 }
 0x4d2   :  { %v589_v10 = vadd.f32 1.0, %v934_v8 }
 0x4d3   :  { %935 = vpow2.f32 %v859_v9 }
 0x4d4   :  { %937 = vrcp.f32 %v589_v10  ;;  %v604_v20 = vand.u32 2147483648, %v589_v10  ;;  %vm598_vm8 = vweird.f32 %v589_v10  ;;  %v602_v22 = vand.u32 2147483647, %v589_v10 }
 0x4d6   :  { %v605_v28 = vor.u32 1.1754944e-38, %v604_v20  ;;  %vm603_vm12 = vcmp.eq.f32.partialorder %v602_v22, 8.507059e+37 }
 0x4d9   :  { %v936_v11 = vpop.eup %935 }
 0x4da   :  { %v938_v12 = vpop.eup %937  ;;  %v590_v13 = vadd.f32 1.0, %v936_v11 }
 0x4db   :  { %v594_v14 = vmul.f32 %v938_v12, %v589_v10  ;;  %vm599_vm7 = vweird.f32 %v938_v12 }
 0x4dc   :  { %939 = vrcp.f32 %v590_v13  ;;  %vm600_vm10 = vmor %vm598_vm8, %vm599_vm7  ;;  %v619_v24 = vand.u32 2147483648, %v590_v13  ;;  %v617_v27 = vand.u32 2147483647, %v590_v13  ;;  %vm613_vm13 = vweird.f32 %v590_v13 }
 0x4dd   :  { %v595_v15 = vsub.f32 1.0, %v594_v14 }
 0x4de   :  { %v620_v32 = vor.u32 1.1754944e-38, %v619_v24  ;;  %vm618_vm15 = vcmp.eq.f32.partialorder %v617_v27, 8.507059e+37 }
 0x4df   :  { %v596_v16 = vmul.f32 %v938_v12, %v595_v15 }
 0x4e1   :  { %v597_v18 = vadd.f32 %v938_v12, %v596_v16 }
 0x4e2   :  { %v940_v17 = vpop.eup %939 }
 0x4e3   :  { %v609_v19 = vmul.f32 %v940_v17, %v590_v13  ;;  %v601_v25 = vsel %vm600_vm10, %v938_v12, %v597_v18  ;;  %vm614_vm11 = vweird.f32 %v940_v17  ;;  %v1009_v13 = vmov 32.0   ;;  %v742_v18 = vpop.permute.xlu1 %741 }
 0x4e4   :  { %v606_v31 = vsel %vm603_vm12, %v605_v28, %v601_v25  ;;  %vm615_vm14 = vmor %vm613_vm13, %vm614_vm11 }
 0x4e5   :  { %v610_v23 = vsub.f32 1.0, %v609_v19  ;;  %v653_v35 = vmul.f32 %v606_v31, %v568_v4 }
 0x4e7   :  { %v611_v26 = vmul.f32 %v940_v17, %v610_v23 }
 0x4e9   :  { %v612_v30 = vadd.f32 %v940_v17, %v611_v26 }
 0x4eb   :  { %v616_v33 = vsel %vm615_vm14, %v940_v17, %v612_v30  ;;  %v744_v27 = vpop.permute.xlu1 %743 }
 0x4ec   :  { %v621_v34 = vsel %vm618_vm15, %v620_v32, %v616_v33 }
 0x4ed   :  { %v654_v36 = vmul.f32 %v621_v34, %v570_v7 }
 0x4ef   :  { %v657_v37 = vpack.c.bf16 %v654_v36, %v653_v35 }
 0x4f1   :  { %862 = vmatmul.msk.bf16.vlgmr.msra.gmra.mxu0 %vm256_vm9, %v657_v37 }
 0x539   :  { %v572_v38 = vpop.f32.mrf.mxu2 }
 0x53a   :  { %v573_v39 = vadd.f32 %v1098_v21, %v572_v38 }
 0x53c   :  { %v860_v40 = vmul.f32 -1.442695, %v573_v39 }
 0x53e   :  { %941 = vpow2.f32 %v860_v40 }
 0x541   :  { %v574_v41 = vpop.f32.mrf.mxu2 }
 0x542   :  { %v575_v42 = vadd.f32 %v1098_v21, %v574_v41 }
 0x544   :  { %v942_v43 = vpop.eup %941  ;;  %v861_v44 = vmul.f32 -1.442695, %v575_v42 }
 0x545   :  { %v591_v45 = vadd.f32 1.0, %v942_v43 }
 0x546   :  { %943 = vpow2.f32 %v861_v44 }
 0x547   :  { %945 = vrcp.f32 %v591_v45  ;;  %v634_v55 = vand.u32 2147483648, %v591_v45  ;;  %vm628_vm2 = vweird.f32 %v591_v45  ;;  %v632_v56 = vand.u32 2147483647, %v591_v45 }
 0x549   :  { %v635_v61 = vor.u32 1.1754944e-38, %v634_v55  ;;  %vm633_vm5 = vcmp.eq.f32.partialorder %v632_v56, 8.507059e+37 }
 0x54c   :  { %v944_v46 = vpop.eup %943 }
 0x54d   :  { %v946_v47 = vpop.eup %945  ;;  %v592_v48 = vadd.f32 1.0, %v944_v46 }
 0x54e   :  { %v624_v49 = vmul.f32 %v946_v47, %v591_v45  ;;  %vm629_vm1 = vweird.f32 %v946_v47 }
 0x54f   :  { %947 = vrcp.f32 %v592_v48  ;;  %vm630_vm3 = vmor %vm628_vm2, %vm629_vm1  ;;  %v649_v57 = vand.u32 2147483648, %v592_v48  ;;  %v647_v60 = vand.u32 2147483647, %v592_v48  ;;  %vm643_vm6 = vweird.f32 %v592_v48 }
 0x550   :  { %v625_v50 = vsub.f32 1.0, %v624_v49  ;;  %949 = vrcp.f32 %v1009_v13 }
 0x551   :  { %v650_v0 = vor.u32 1.1754944e-38, %v649_v57  ;;  %vm648_vm8 = vcmp.eq.f32.partialorder %v647_v60, 8.507059e+37 }
 0x552   :  { %v626_v51 = vmul.f32 %v946_v47, %v625_v50 }
 0x554   :  { %v627_v53 = vadd.f32 %v946_v47, %v626_v51 }
 0x555   :  { %v948_v52 = vpop.eup %947 }
 0x556   :  { %v639_v54 = vmul.f32 %v948_v52, %v592_v48  ;;  %v631_v58 = vsel %vm630_vm3, %v946_v47, %v627_v53  ;;  %vm644_vm4 = vweird.f32 %v948_v52  ;;  %v950_v15 = vpop.eup %949  ;;  %v884_v48 = vld [vmem:[%s1186_s7] ss:$0 sm:$0xff]  ;;  %s1010_s7 = smov [#allocation3]  }
 0x557   :  { %v636_v63 = vsel %vm633_vm5, %v635_v61, %v631_v58  ;;  %vm645_vm7 = vmor %vm643_vm6, %vm644_vm4  ;;  %v701_v17 = vmul.f32 32.0, %v950_v15  ;;  %s769_s11 = sshll.u32 %s1010_s7, 4  ;;  %s770_s11 = int_to_ptr.vmem [resolvable:$true] %s769_s11 }
 0x558   :  { %v640_v21 = vsub.f32 1.0, %v639_v54  ;;  %v655_v3 = vmul.f32 %v636_v63, %v573_v39 }
 0x559   :  { %v702_v20 = vsub.f32 1.0, %v701_v17 }
 0x55a   :  { %v641_v59 = vmul.f32 %v948_v52, %v640_v21 }
 0x55b   :  { %v703_v23 = vmul.f32 %v950_v15, %v702_v20 }
 0x55c   :  { %v642_v62 = vadd.f32 %v948_v52, %v641_v59 }
 0x55d   :  { %v704_v26 = vadd.f32 %v950_v15, %v703_v23 }
 0x55e   :  { %v646_v1 = vsel %vm645_vm7, %v948_v52, %v642_v62 }
 0x55f   :  { %v651_v2 = vsel %vm648_vm8, %v650_v0, %v646_v1 }
 0x560   :  { %v656_v4 = vmul.f32 %v651_v2, %v575_v42 }
 0x562   :  { %v658_v5 = vpack.c.bf16 %v656_v4, %v655_v3 }
 0x564   :  { %863 = vmatmul.msk.bf16.gmra.mxu0 %vm256_vm9, %v658_v5  ;;  %vm705_vm9 = vweird.f32 %v950_v15 }
 0x565   :  { %v706_v32 = vsel %vm705_vm9, %v950_v15, %v704_v26 }
 0x56e   :  { %v674_v6 = vpop.f32.mrf.mxu0 }
 0x56f   :  { %v675_v7 = vadd.f32 %v1118_v29, %v674_v6 }
 0x571   :  { %684 = vst.msk [vmem:[#allocation2] sm:$0xff] %vm57_vm0, %v675_v7 }
 0x576   :  { %v676_v8 = vpop.f32.mrf.mxu0 }
 0x577   :  { %v677_v9 = vadd.f32 %v1118_v29, %v676_v8 }
 0x578   :  { %v688_v39 = vld [vmem:[#allocation2] sm:$0xff] }
 0x579   :  { %685 = vst.msk [vmem:[#allocation2 + $0x8] sm:$0xff] %vm57_vm0, %v677_v9  ;;  %v692_v40 = vmul.f32 %v688_v39, %v688_v39 }
 0x57b   :  { %v694_v42 = vsel %vm57_vm0, %v692_v40, 0.0 }
 0x580   :  { %v689_v10 = vld [vmem:[#allocation2 + $0x8] sm:$0xff] }
 0x581   :  { %v693_v11 = vmul.f32 %v689_v10, %v689_v10 }
 0x583   :  { %v697_v12 = vsel %vm57_vm0, %v693_v11, 0.0 }
 0x584   :  { %698 = vadd.xlane.f32.xlu0 %v697_v12 }
 0x5e1   :  { %v679_v14 = vpop.f32.mrf.mxu0 }
 0x5e2   :  { %v680_v16 = vadd.f32 %v1118_v29, %v679_v14 }
 0x5e4   :  { %686 = vst.msk [vmem:[#allocation2 + $0x10] sm:$0xff] %vm57_vm0, %v680_v16 }
 0x5e9   :  { %v681_v19 = vpop.f32.mrf.mxu0 }
 0x5ea   :  { %v682_v22 = vadd.f32 %v1118_v29, %v681_v19 }
 0x5eb   :  { %v690_v24 = vld [vmem:[#allocation2 + $0x10] sm:$0xff] }
 0x5ec   :  { %687 = vst.msk [vmem:[#allocation2 + $0x18] sm:$0xff] %vm57_vm0, %v682_v22  ;;  %v747_v25 = vsub.f32 %v690_v24, %v742_v18 }
 0x5ee   :  { %v749_v31 = vmul.f32 %v747_v25, %v747_v25 }
 0x5f0   :  { %v751_v36 = vsel %vm57_vm0, %v749_v31, 0.0 }
 0x5f3   :  { %v691_v28 = vld [vmem:[#allocation2 + $0x18] sm:$0xff] }
 0x5f4   :  { %v748_v30 = vsub.f32 %v691_v28, %v744_v27 }
 0x5f6   :  { %v750_v33 = vmul.f32 %v748_v30, %v748_v30 }
 0x5f7   :  { %v699_v34 = vpop.xlane.xlu0 %698 }
 0x5f8   :  { %v708_v35 = vmul.f32 %v706_v32, %v699_v34  ;;  %v752_v37 = vsel %vm57_vm0, %v750_v33, 0.0 }
 0x5f9   :  { %v753_v29 = vadd.f32 %v752_v37, %v751_v36 }
 0x5fa   :  { %v710_v38 = vadd.f32 0.02, %v708_v35 }
 0x5fb   :  { %754 = vadd.xlane.f32.xlu2 %v753_v29 }
 0x5fc   :  { %951 = vrsqrt.f32 %v710_v38  ;;  %vm727_vm11 = vweird.f32 %v710_v38 }
 0x602   :  { %v952_v41 = vpop.eup %951 }
 0x603   :  { %v722_v43 = vmul.f32 %v952_v41, %v710_v38  ;;  %695 = vadd.xlane.f32.xlu2 %v694_v42  ;;  %vm728_vm10 = vweird.f32 %v952_v41 }
 0x604   :  { %vm729_vm12 = vmor %vm727_vm11, %vm728_vm10 }
 0x605   :  { %v723_v44 = vmul.f32 %v952_v41, %v722_v43 }
 0x607   :  { %v724_v45 = vmul.f32 0.5, %v723_v44 }
 0x609   :  { %v725_v46 = vsub.f32 1.5, %v724_v45 }
 0x60b   :  { %v726_v47 = vmul.f32 %v952_v41, %v725_v46 }
 0x60d   :  { %v730_v49 = vsel %vm729_vm12, %v952_v41, %v726_v47 }
 0x60e   :  { %v732_v50 = vmul.f32 %v730_v49, %v689_v10 }
 0x610   :  { %v738_v51 = vmul.f32 %v884_v48, %v732_v50 }
 0x612   :  { %740 = vst.msk [vmem:[#allocation3 + $0x8] sm:$0xff] %vm57_vm0, %v738_v51 }
 0x66e   :  { %v755_v52 = vpop.xlane.xlu2 %754 }
 0x66f   :  { %v756_v53 = vrot.slane %v755_v52, 4 }
 0x671   :  { %v757_v54 = vadd.f32 %v756_v53, %v755_v52 }
 0x673   :  { %v758_v55 = vrot.slane %v757_v54, 2 }
 0x675   :  { %v759_v56 = vadd.f32 %v758_v55, %v757_v54 }
 0x676   :  { %v696_v21 = vpop.xlane.xlu2 %695 }
 0x677   :  { %v707_v57 = vmul.f32 %v706_v32, %v696_v21  ;;  %v760_v58 = vrot.slane %v759_v56, 1 }
 0x679   :  { %v709_v59 = vadd.f32 0.02, %v707_v57  ;;  %v761_v60 = vadd.f32 %v760_v58, %v759_v56 }
 0x67b   :  { %953 = vrsqrt.f32 %v709_v59  ;;  %872 = vpush %v761_v60  ;;  %vm717_vm14 = vweird.f32 %v709_v59 }
 0x681   :  { %v954_v61 = vpop.eup %953 }
 0x682   :  { %v712_v62 = vmul.f32 %v954_v61, %v709_v59  ;;  %vm718_vm13 = vweird.f32 %v954_v61 }
 0x683   :  { %vm719_vm15 = vmor %vm717_vm14, %vm718_vm13 }
 0x684   :  { %v713_v63 = vmul.f32 %v954_v61, %v712_v62 }
 0x686   :  { %v714_v0 = vmul.f32 0.5, %v713_v63 }
 0x688   :  { %v715_v1 = vsub.f32 1.5, %v714_v0 }
 0x68a   :  { %v716_v2 = vmul.f32 %v954_v61, %v715_v1 }
 0x68c   :  { %v720_v3 = vsel %vm719_vm15, %v954_v61, %v716_v2 }
 0x68d   :  { %v731_v4 = vmul.f32 %v720_v3, %v688_v39 }
 0x68f   :  { %v737_v5 = vmul.f32 %v884_v48, %v731_v4 }
 0x691   :  { %739 = vst.msk [vmem:[#allocation3] sm:$0xff] %vm57_vm0, %v737_v5 }
 0x692   :  { %777 = dma.vmem_to_hbm [thread:$0]  %s770_s11, 256, %s772_s14, [#allocation4], %s1011_s15, %s1011_s15, %s1012_s16  }
 0x6ac   :  { %s873_s20 = spop %872 }
 0x6ad   :  { %v763_v6 = vstv %s873_s20 }
 0x6ae   :  { %764 = vst [vmem:[#allocation5] sm:$0x1] %v763_v6 }
 0x6af   :  { %788 = dma.vmem_to_hbm [thread:$0]  %s784_s18, 16, %s786_s0, [#allocation6]  }
 0x6b0   :  { %1003 = dma.done.wait [#allocation4], 256  }
 0x6b1   :  { %1004 = vsyncadd [#allocation4], 4294967040 }
 0x6b2   :  { %1005 = dma.done.wait [#allocation6], 16  }
 0x6b3   :  { %1006 = vsyncadd [#allocation6], 4294967280 }
 0x6b4   :  { %797 = vsyncpa [#allocation4], 1 }
 0x6b5   :  { %798 = vsyncpa [#allocation6], 1 }

</bundles_post_ra>
